<compile_context>
chip_gen: v6e
topology: v6e:2x2x1
jax: 0.10.0
libtpu: 0.0.40
codegen_flags: <defaults>
</compile_context>

<pallas_src>
import functools

import numpy as np

import jax
import jax.numpy as jnp
from jax.experimental import pallas as pl
from jax.experimental.pallas import tpu as pltpu


# ----------------------------------------------------------------------------
# Pallas kernels
# ----------------------------------------------------------------------------
def _conv_gemm_pool_kernel(a_ref, w_ref, b_ref, o_ref):
    """relu(maxpool2x2(conv) + bias) for one lane-tile of pooled output columns.

    a_ref : (K, 4*tM) bf16  the 4 pooling-corner im2col slabs of this tile,
                            concatenated along lanes (each corner tM wide).
    w_ref : (Cout, K) bf16  conv weight, flattened with (Cin, KH, KW) minor.
    b_ref : (Cout, 1) f32
    o_ref : (Cout, tM) f32  pooled + biased + ReLU'd output tile (lane-dense).

    One MXU dot; the pooling max runs on the VPU over static 128-aligned lane
    slices.  maxpool commutes with the (corner-invariant) bias add and the
    monotone ReLU, so this equals maxpool(relu(conv(x) + bias)).
    """
    tM = o_ref.shape[1]
    acc = jnp.dot(w_ref[...], a_ref[...], preferred_element_type=jnp.float32)
    m = jnp.maximum(jnp.maximum(acc[:, 0:tM], acc[:, tM:2 * tM]),
                    jnp.maximum(acc[:, 2 * tM:3 * tM], acc[:, 3 * tM:4 * tM]))
    o_ref[...] = jnp.maximum(m + b_ref[...], 0.0).astype(o_ref.dtype)


def _conv3_fc_kernel(a3_ref, w3_ref, b3_ref, w1_ref, b1_ref, w2_ref, b2_ref,
                     o_ref, *, n_hw):
    """Fused conv3(+bias+ReLU+maxpool2x2) -> flatten -> fc1+ReLU -> fc2+ReLU.

    a3_ref : (n_hw*4, B, K3) bf16  per (pooled-position, corner) im2col rows
    w3_ref : (K3, C3)  bf16        conv3 weight, transposed to (K, Cout)
    b3_ref : (1, C3)   f32
    w1_ref : (n_hw, C3, N1) bf16   fc1 weight regrouped by pooled position so
                                   the NCHW flatten never needs a transpose
    b1_ref : (1, N1)   f32
    w2_ref : (N1, N2)  bf16        fc2 weight, transposed to (in, out)
    b2_ref : (1, N2)   f32
    o_ref  : (B, N2)   f32
    """
    w3 = w3_ref[...]
    b3 = b3_ref[...]
    h1 = None
    for hw in range(n_hw):                       # pooled spatial positions (4)
        s = jnp.dot(a3_ref[4 * hw], w3, preferred_element_type=jnp.float32)
        for c in range(1, 4):                    # max over the 2x2 pooling corners
            s = jnp.maximum(
                s, jnp.dot(a3_ref[4 * hw + c], w3,
                           preferred_element_type=jnp.float32))
        p = jnp.maximum(s + b3, 0.0).astype(jnp.bfloat16)            # (B, C3)
        t = jnp.dot(p, w1_ref[hw], preferred_element_type=jnp.float32)  # (B, N1)
        h1 = t if h1 is None else h1 + t
    h1 = jnp.maximum(h1 + b1_ref[...], 0.0).astype(jnp.bfloat16)     # (B, N1)
    o = jnp.dot(h1, w2_ref[...], preferred_element_type=jnp.float32) + b2_ref[...]
    o_ref[...] = jnp.maximum(o, 0.0).astype(o_ref.dtype)


# ----------------------------------------------------------------------------
# Fused Conv2d_Q + ReLU + MaxPool2d(2)   (conv1, conv2)
# ----------------------------------------------------------------------------
def conv_relu_pool(x_cbhw, w4, b):
    """Valid conv (stride 1) + bias + ReLU + MaxPool2d(2).

    x_cbhw : (Cin, B, H, W)       activations, channel-major layout
    w4     : (Cout, Cin, KH, KW)  PyTorch conv weight layout (bf16)
    b      : (Cout,)              f32
    returns (Cout, B, Ho, Wo)     f32
    """
    Cin, B, H, W = x_cbhw.shape
    Cout, Cin2, KH, KW = w4.shape
    assert Cin == Cin2
    OH, OW = H - KH + 1, W - KW + 1
    Ho, Wo = OH // 2, OW // 2       # MaxPool2d(2) floor behavior
    K = Cin * KH * KW
    M = B * Ho * Wo

    xb = x_cbhw.astype(jnp.bfloat16)
    # one stride-1 im2col slab, then 4 pooling-parity strided slices of it.
    taps = [xb[:, :, kh:kh + OH, kw:kw + OW]
            for kh in range(KH) for kw in range(KW)]
    slab = jnp.stack(taps, axis=1).reshape(K, B, OH, OW)
    corners = [slab[:, :, p:p + 2 * Ho:2, q:q + 2 * Wo:2].reshape(K, M)
               for p in range(2) for q in range(2)]
    a = jnp.stack(corners, axis=1)                       # (K, 4, M)

    # lane tiling: single grid block unless the block busts a conservative
    # VMEM budget (v7x-safe: well under the 32 MiB scoped default there).
    M_pad = pl.cdiv(M, 128) * 128
    budget = 8 * 2**20

    def _tile_bytes(t):
        return (2 * (4 * K * t) * 2       # double-buffered corner-slab block (bf16)
                + 2 * (Cout * t) * 4      # double-buffered output block (f32)
                + Cout * K * 2 + Cout * 4)

    if _tile_bytes(M_pad) <= budget:
        tM = M_pad                         # single grid step (overhead-bound regime)
    else:
        tM = 128
        for cand in (4096, 2048, 1024, 512, 256):
            if _tile_bytes(cand) <= budget:
                tM = cand
                break
        M_pad = pl.cdiv(M, tM) * tM
    num_m = M_pad // tM

    if M_pad != M:
        a = jnp.pad(a, ((0, 0), (0, 0), (0, M_pad - M)))
    # (K, 4, M_pad) -> (K, num_m*4*tM): the 4 corners of each lane tile adjacent
    a = a.reshape(K, 4, num_m, tM).transpose(0, 2, 1, 3).reshape(K, num_m * 4 * tM)

    wf = w4.reshape(Cout, K).astype(jnp.bfloat16)   # contiguous reshape: free
    b2 = b.reshape(Cout, 1).astype(jnp.float32)

    out = pl.pallas_call(
        _conv_gemm_pool_kernel,
        out_shape=jax.ShapeDtypeStruct((Cout, M_pad), jnp.float32),
        grid=(num_m,),
        in_specs=[
            pl.BlockSpec((K, 4 * tM), lambda m: (0, m)),
            pl.BlockSpec((Cout, K), lambda m: (0, 0)),
            pl.BlockSpec((Cout, 1), lambda m: (0, 0)),
        ],
        out_specs=pl.BlockSpec((Cout, tM), lambda m: (0, m)),
        compiler_params=pltpu.CompilerParams(
            dimension_semantics=("parallel",)),
    )(a, wf, b2)

    # padded columns hold relu(bias); slice them off before reshaping.
    return out[:, :M].reshape(Cout, B, Ho, Wo)


# ----------------------------------------------------------------------------
# Fused conv3 + ReLU + MaxPool2d(2) + flatten + fc1 + ReLU + fc2 + ReLU
# ----------------------------------------------------------------------------
def conv3_fc_forward(h2, p):
    """h2: (C2, B, H2, W2) f32 conv2 output.  Returns (B, N2) f32."""
    C2, B, H2, W2 = h2.shape
    KH, KW = p["conv3_khw"]
    K3 = C2 * KH * KW
    C3 = p["conv3_wt"].shape[1]
    N1 = p["fc1_wg"].shape[2]
    N2 = p["fc2_wt"].shape[1]
    OH, OW = H2 - KH + 1, W2 - KW + 1
    Ho, Wo = OH // 2, OW // 2
    HW = Ho * Wo
    assert p["fc1_wg"].shape[0] == HW and p["fc1_wg"].shape[1] == C3

    xb = h2.astype(jnp.bfloat16)
    taps = [xb[:, :, kh:kh + OH, kw:kw + OW]
            for kh in range(KH) for kw in range(KW)]
    slab = jnp.stack(taps, axis=1).reshape(K3, B, OH, OW)[:, :, :2 * Ho, :2 * Wo]
    # (K3, B, 2Ho, 2Wo) -> rows ordered (oh, ow, p, q), cols (b, k)
    slab = slab.reshape(K3, B, Ho, 2, Wo, 2)
    a3 = slab.transpose(2, 4, 3, 5, 1, 0).reshape(HW * 4, B, K3)   # (HW*4, B, K3)

    kernel = functools.partial(_conv3_fc_kernel, n_hw=HW)
    return pl.pallas_call(
        kernel,
        out_shape=jax.ShapeDtypeStruct((B, N2), jnp.float32),
        grid=(1,),
        in_specs=[
            pl.BlockSpec((HW * 4, B, K3), lambda i: (0, 0, 0)),
            pl.BlockSpec((K3, C3), lambda i: (0, 0)),
            pl.BlockSpec((1, C3), lambda i: (0, 0)),
            pl.BlockSpec((HW, C3, N1), lambda i: (0, 0, 0)),
            pl.BlockSpec((1, N1), lambda i: (0, 0)),
            pl.BlockSpec((N1, N2), lambda i: (0, 0)),
            pl.BlockSpec((1, N2), lambda i: (0, 0)),
        ],
        out_specs=pl.BlockSpec((B, N2), lambda i: (0, 0)),
    )(a3, p["conv3_wt"], p["conv3_b"], p["fc1_wg"], p["fc1_b"],
      p["fc2_wt"], p["fc2_b"])


# ----------------------------------------------------------------------------
# AlexNetFeature forward (3 pallas_calls total)
# ----------------------------------------------------------------------------
def alexnet_feature_forward(x, params):
    """x: (B, Cin, H, W) f32, NCHW (PyTorch convention). Dropout = identity."""
    h = jnp.transpose(x, (1, 0, 2, 3))                       # (Cin, B, H, W)
    h = conv_relu_pool(h, params["conv1_w"], params["conv1_b"])
    h = conv_relu_pool(h, params["conv2_w"], params["conv2_b"])
    return conv3_fc_forward(h, params)                       # (B, f2) f32


# ----------------------------------------------------------------------------
# Parameter construction / one-time prep
# ----------------------------------------------------------------------------
def make_params(key, ncha, size, mul, experiment="mixture5"):
    c1 = round(64 * mul)
    c2 = round(128 * mul)
    c3 = round(256 * mul)
    k1 = size // 8
    k2 = size // 10
    k3 = 2

    def cos(L, k):
        return (L - k) + 1  # stride 1, pad 0, dil 1

    s = cos(size, k1) // 2
    s = cos(s, k2) // 2
    s = cos(s, k3) // 2

    if experiment == "mixture5":
        f1_out = round(2048 * mul)
        f2_out = round(2048 * mul)
    else:  # 'cifar'
        f1_out = 2048
        f2_out = 2048
    f1_in = c3 * s * s

    shapes = {
        "conv1_w": (c1, ncha, k1, k1), "conv1_b": (c1,),
        "conv2_w": (c2, c1, k2, k2),   "conv2_b": (c2,),
        "conv3_w": (c3, c2, k3, k3),   "conv3_b": (c3,),
        "fc1_w": (f1_out, f1_in),      "fc1_b": (f1_out,),
        "fc2_w": (f2_out, f1_out),     "fc2_b": (f2_out,),
    }
    params = {}
    for name, shape in sorted(shapes.items()):
        key, sub = jax.random.split(key)
        params[name] = 0.05 * jax.random.normal(sub, shape, dtype=jnp.float32)
    return params, s


def prep_params(params):
    """One-time parameter prep, OUTSIDE the jitted forward:
      conv1/2 weights -> bf16 (GEMM flatten later is a free reshape),
      conv3 weight    -> (K3, C3) bf16,
      fc1 weight      -> regrouped by pooled spatial position (HW3, C3, N1) bf16
                         (folds the NCHW flatten permutation into the weight),
      fc2 weight      -> (in, out) bf16, biases -> f32 row vectors."""
    p = {}
    for i in (1, 2):
        p[f"conv{i}_w"] = params[f"conv{i}_w"].astype(jnp.bfloat16)
        p[f"conv{i}_b"] = params[f"conv{i}_b"].astype(jnp.float32)

    w3 = params["conv3_w"]                              # (C3, C2, KH, KW)
    C3, C2, KH3, KW3 = w3.shape
    p["conv3_wt"] = jnp.asarray(w3).reshape(C3, C2 * KH3 * KW3).T.astype(jnp.bfloat16)
    p["conv3_b"] = params["conv3_b"].reshape(1, C3).astype(jnp.float32)
    p["conv3_khw"] = (KH3, KW3)

    w1 = params["fc1_w"]                                # (N1, C3*s*s)
    N1 = w1.shape[0]
    HW3 = w1.shape[1] // C3
    p["fc1_wg"] = (jnp.asarray(w1).reshape(N1, C3, HW3)
                   .transpose(2, 1, 0).astype(jnp.bfloat16))   # (HW3, C3, N1)
    p["fc1_b"] = params["fc1_b"].reshape(1, N1).astype(jnp.float32)

    w2 = params["fc2_w"]                                # (N2, N1)
    p["fc2_wt"] = jnp.asarray(w2).T.astype(jnp.bfloat16)        # (N1, N2)
    p["fc2_b"] = params["fc2_b"].reshape(1, w2.shape[0]).astype(jnp.float32)
    return p


# ----------------------------------------------------------------------------
# Pure-JAX f32 reference (verification only)
# ----------------------------------------------------------------------------
def _ref_conv_relu_pool(h, w, b):
    y = jax.lax.conv_general_dilated(
        h, w, window_strides=(1, 1), padding="VALID",
        dimension_numbers=("NCHW", "OIHW", "NCHW"),
        precision=jax.lax.Precision.HIGHEST)
    y = jnp.maximum(y + b.reshape(1, -1, 1, 1), 0.0)
    Ho, Wo = y.shape[2] // 2, y.shape[3] // 2
    y = y[:, :, :2 * Ho, :2 * Wo]
    return jnp.maximum(
        jnp.maximum(y[:, :, 0::2, 0::2], y[:, :, 0::2, 1::2]),
        jnp.maximum(y[:, :, 1::2, 0::2], y[:, :, 1::2, 1::2]))


def reference_forward(x, params):
    h1 = _ref_conv_relu_pool(x, params["conv1_w"], params["conv1_b"])
    h = _ref_conv_relu_pool(h1, params["conv2_w"], params["conv2_b"])
    h = _ref_conv_relu_pool(h, params["conv3_w"], params["conv3_b"])
    B = x.shape[0]
    h = h.reshape(B, -1)
    h = jnp.maximum(jnp.dot(h, params["fc1_w"].T,
                            precision=jax.lax.Precision.HIGHEST)
                    + params["fc1_b"], 0.0)
    h = jnp.maximum(jnp.dot(h, params["fc2_w"].T,
                            precision=jax.lax.Precision.HIGHEST)
                    + params["fc2_b"], 0.0)
    return h, h1


if __name__ == "__main__":
    # small, self-consistent configuration:
    #   inputsize = (4, 32, 32), mul = 0.125, experiment = 'mixture5'
    NCHA, SIZE = 4, 32
    MUL = 0.125
    BATCH = 2

    key = jax.random.PRNGKey(0)
    key, pkey, xkey = jax.random.split(key, 3)
    params, s_final = make_params(pkey, NCHA, SIZE, MUL, experiment="mixture5")
    x = jax.random.normal(xkey, (BATCH, NCHA, SIZE, SIZE), dtype=jnp.float32)

    prepped = prep_params(params)
    fwd = jax.jit(functools.partial(alexnet_feature_forward, params=prepped))
    out = fwd(x)
    jax.block_until_ready(out)

    # ---- correctness vs. a pure-JAX f32 reference (tolerances cover bf16) ---
    ref_out, ref_l1 = reference_forward(x, params)

    l1_fn = jax.jit(lambda xi: jnp.transpose(
        conv_relu_pool(jnp.transpose(xi, (1, 0, 2, 3)),
                       prepped["conv1_w"], prepped["conv1_b"]),
        (1, 0, 2, 3)))
    np.testing.assert_allclose(np.asarray(l1_fn(x)), np.asarray(ref_l1),
                               rtol=5e-2, atol=2e-2)
    np.testing.assert_allclose(np.asarray(out), np.asarray(ref_out),
                               rtol=5e-2, atol=2e-2)

    expected_feat = round(2048 * MUL)
    assert out.shape == (BATCH, expected_feat), out.shape
    assert bool(jnp.all(out >= 0.0))  # final ReLU

    print("KERNEL_OK")
</pallas_src>

<mosaic_0001>
module attributes {stable_mosaic.version = 11 : i64} {
  func.func @_conv_gemm_pool_kernel(%arg0: i32, %arg1: memref<64x2048xbf16, #tpu.memory_space<vmem>>, %arg2: memref<8x64xbf16, #tpu.memory_space<vmem>>, %arg3: memref<8x1xf32, #tpu.memory_space<vmem>>, %arg4: memref<8x512xf32, #tpu.memory_space<vmem>>) attributes {dimension_semantics = [#tpu.dimension_semantics<parallel>], iteration_bounds = array<i64: 1>, scalar_prefetch = 0 : i64, scratch_operands = 0 : i64, tpu.core_type = #tpu.core_type<tc>, window_params = [{transform_indices = @transform_0, window_bounds = array<i64: 64, 2048>}, {pipeline_mode = #tpu.pipeline_mode<synchronous>, transform_indices = @transform_1, window_bounds = array<i64: 8, 64>}, {pipeline_mode = #tpu.pipeline_mode<synchronous>, transform_indices = @transform_2, window_bounds = array<i64: 8, 1>}, {transform_indices = @transform_3, window_bounds = array<i64: 8, 512>}]} {
    %c0 = arith.constant 0 : index
    %c0_0 = arith.constant 0 : index
    %0 = vector.load %arg2[%c0, %c0_0] : memref<8x64xbf16, #tpu.memory_space<vmem>>, vector<8x64xbf16>
    %c0_1 = arith.constant 0 : index
    %c0_2 = arith.constant 0 : index
    %1 = vector.load %arg1[%c0_1, %c0_2] : memref<64x2048xbf16, #tpu.memory_space<vmem>>, vector<64x2048xbf16>
    %cst = arith.constant dense<0.000000e+00> : vector<8x2048xf32>
    %2 = tpu.matmul %0, %1, %cst {dimension_numbers = #tpu.dot_dimension_numbers<[1], [0], [0], [1], [0, 0, 1, 1], [], []>} : vector<8x64xbf16>, vector<64x2048xbf16>, vector<8x2048xf32> -> vector<8x2048xf32>
    %3 = vector.extract_strided_slice %2 {offsets = [0, 0], sizes = [8, 512], strides = [1, 1]} : vector<8x2048xf32> to vector<8x512xf32>
    %4 = vector.extract_strided_slice %2 {offsets = [0, 512], sizes = [8, 512], strides = [1, 1]} : vector<8x2048xf32> to vector<8x512xf32>
    %5 = arith.maximumf %3, %4 : vector<8x512xf32>
    %6 = vector.extract_strided_slice %2 {offsets = [0, 1024], sizes = [8, 512], strides = [1, 1]} : vector<8x2048xf32> to vector<8x512xf32>
    %7 = vector.extract_strided_slice %2 {offsets = [0, 1536], sizes = [8, 512], strides = [1, 1]} : vector<8x2048xf32> to vector<8x512xf32>
    %8 = arith.maximumf %6, %7 : vector<8x512xf32>
    %9 = arith.maximumf %5, %8 : vector<8x512xf32>
    %c0_3 = arith.constant 0 : index
    %c0_4 = arith.constant 0 : index
    %10 = vector.load %arg3[%c0_3, %c0_4] : memref<8x1xf32, #tpu.memory_space<vmem>>, vector<8x1xf32>
    %11 = vector.broadcast %10 : vector<8x1xf32> to vector<8x512xf32>
    %12 = arith.addf %9, %11 : vector<8x512xf32>
    %cst_5 = arith.constant 0.000000e+00 : f32
    %13 = vector.broadcast %cst_5 : f32 to vector<8x512xf32>
    %14 = arith.maximumf %12, %13 : vector<8x512xf32>
    %c0_6 = arith.constant 0 : index
    %c0_7 = arith.constant 0 : index
    %15 = vector.load %arg4[%c0_6, %c0_7] : memref<8x512xf32, #tpu.memory_space<vmem>>, vector<8x512xf32>
    tpu.vector_store %arg4[%c0_6, %c0_7], %14 {strides = array<i32>} : memref<8x512xf32, #tpu.memory_space<vmem>>, vector<8x512xf32>,
    return
  }
  func.func @transform_0(%arg0: i32) -> (i32, i32) {
    %c0_i32 = arith.constant 0 : i32
    %c0_i32_0 = arith.constant 0 : i32
    return %c0_i32, %arg0 : i32, i32
  }
  func.func @transform_1(%arg0: i32) -> (i32, i32) {
    %c0_i32 = arith.constant 0 : i32
    %c0_i32_0 = arith.constant 0 : i32
    %c0_i32_1 = arith.constant 0 : i32
    return %c0_i32, %c0_i32_0 : i32, i32
  }
  func.func @transform_2(%arg0: i32) -> (i32, i32) {
    %c0_i32 = arith.constant 0 : i32
    %c0_i32_0 = arith.constant 0 : i32
    %c0_i32_1 = arith.constant 0 : i32
    return %c0_i32, %c0_i32_0 : i32, i32
  }
  func.func @transform_3(%arg0: i32) -> (i32, i32) {
    %c0_i32 = arith.constant 0 : i32
    %c0_i32_0 = arith.constant 0 : i32
    return %c0_i32, %arg0 : i32, i32
  }
}

module attributes {stable_mosaic.version = 11 : i64} {
  func.func @_conv_gemm_pool_kernel(%arg0: i32, %arg1: memref<72x512xbf16, #tpu.memory_space<vmem>>, %arg2: memref<16x72xbf16, #tpu.memory_space<vmem>>, %arg3: memref<16x1xf32, #tpu.memory_space<vmem>>, %arg4: memref<16x128xf32, #tpu.memory_space<vmem>>) attributes {dimension_semantics = [#tpu.dimension_semantics<parallel>], iteration_bounds = array<i64: 1>, scalar_prefetch = 0 : i64, scratch_operands = 0 : i64, tpu.core_type = #tpu.core_type<tc>, window_params = [{transform_indices = @transform_0, window_bounds = array<i64: 72, 512>}, {pipeline_mode = #tpu.pipeline_mode<synchronous>, transform_indices = @transform_1, window_bounds = array<i64: 16, 72>}, {pipeline_mode = #tpu.pipeline_mode<synchronous>, transform_indices = @transform_2, window_bounds = array<i64: 16, 1>}, {transform_indices = @transform_3, window_bounds = array<i64: 16, 128>}]} {
    %c0 = arith.constant 0 : index
    %c0_0 = arith.constant 0 : index
    %0 = vector.load %arg2[%c0, %c0_0] : memref<16x72xbf16, #tpu.memory_space<vmem>>, vector<16x72xbf16>
    %c0_1 = arith.constant 0 : index
    %c0_2 = arith.constant 0 : index
    %1 = vector.load %arg1[%c0_1, %c0_2] : memref<72x512xbf16, #tpu.memory_space<vmem>>, vector<72x512xbf16>
    %cst = arith.constant dense<0.000000e+00> : vector<16x512xf32>
    %2 = tpu.matmul %0, %1, %cst {dimension_numbers = #tpu.dot_dimension_numbers<[1], [0], [0], [1], [0, 0, 1, 1], [], []>} : vector<16x72xbf16>, vector<72x512xbf16>, vector<16x512xf32> -> vector<16x512xf32>
    %3 = vector.extract_strided_slice %2 {offsets = [0, 0], sizes = [16, 128], strides = [1, 1]} : vector<16x512xf32> to vector<16x128xf32>
    %4 = vector.extract_strided_slice %2 {offsets = [0, 128], sizes = [16, 128], strides = [1, 1]} : vector<16x512xf32> to vector<16x128xf32>
    %5 = arith.maximumf %3, %4 : vector<16x128xf32>
    %6 = vector.extract_strided_slice %2 {offsets = [0, 256], sizes = [16, 128], strides = [1, 1]} : vector<16x512xf32> to vector<16x128xf32>
    %7 = vector.extract_strided_slice %2 {offsets = [0, 384], sizes = [16, 128], strides = [1, 1]} : vector<16x512xf32> to vector<16x128xf32>
    %8 = arith.maximumf %6, %7 : vector<16x128xf32>
    %9 = arith.maximumf %5, %8 : vector<16x128xf32>
    %c0_3 = arith.constant 0 : index
    %c0_4 = arith.constant 0 : index
    %10 = vector.load %arg3[%c0_3, %c0_4] : memref<16x1xf32, #tpu.memory_space<vmem>>, vector<16x1xf32>
    %11 = vector.broadcast %10 : vector<16x1xf32> to vector<16x128xf32>
    %12 = arith.addf %9, %11 : vector<16x128xf32>
    %cst_5 = arith.constant 0.000000e+00 : f32
    %13 = vector.broadcast %cst_5 : f32 to vector<16x128xf32>
    %14 = arith.maximumf %12, %13 : vector<16x128xf32>
    %c0_6 = arith.constant 0 : index
    %c0_7 = arith.constant 0 : index
    %15 = vector.load %arg4[%c0_6, %c0_7] : memref<16x128xf32, #tpu.memory_space<vmem>>, vector<16x128xf32>
    tpu.vector_store %arg4[%c0_6, %c0_7], %14 {strides = array<i32>} : memref<16x128xf32, #tpu.memory_space<vmem>>, vector<16x128xf32>,
    return
  }
  func.func @transform_0(%arg0: i32) -> (i32, i32) {
    %c0_i32 = arith.constant 0 : i32
    %c0_i32_0 = arith.constant 0 : i32
    return %c0_i32, %arg0 : i32, i32
  }
  func.func @transform_1(%arg0: i32) -> (i32, i32) {
    %c0_i32 = arith.constant 0 : i32
    %c0_i32_0 = arith.constant 0 : i32
    %c0_i32_1 = arith.constant 0 : i32
    return %c0_i32, %c0_i32_0 : i32, i32
  }
  func.func @transform_2(%arg0: i32) -> (i32, i32) {
    %c0_i32 = arith.constant 0 : i32
    %c0_i32_0 = arith.constant 0 : i32
    %c0_i32_1 = arith.constant 0 : i32
    return %c0_i32, %c0_i32_0 : i32, i32
  }
  func.func @transform_3(%arg0: i32) -> (i32, i32) {
    %c0_i32 = arith.constant 0 : i32
    %c0_i32_0 = arith.constant 0 : i32
    return %c0_i32, %arg0 : i32, i32
  }
}

module attributes {stable_mosaic.version = 11 : i64} {
  func.func @_conv3_fc_kernel(%arg0: i32, %arg1: memref<16x2x64xbf16, #tpu.memory_space<vmem>>, %arg2: memref<64x32xbf16, #tpu.memory_space<vmem>>, %arg3: memref<1x32xf32, #tpu.memory_space<vmem>>, %arg4: memref<4x32x256xbf16, #tpu.memory_space<vmem>>, %arg5: memref<1x256xf32, #tpu.memory_space<vmem>>, %arg6: memref<256x256xbf16, #tpu.memory_space<vmem>>, %arg7: memref<1x256xf32, #tpu.memory_space<vmem>>, %arg8: memref<2x256xf32, #tpu.memory_space<vmem>>) attributes {dimension_semantics = [#tpu.dimension_semantics<arbitrary>], iteration_bounds = array<i64: 1>, scalar_prefetch = 0 : i64, scratch_operands = 0 : i64, tpu.core_type = #tpu.core_type<tc>, window_params = [{pipeline_mode = #tpu.pipeline_mode<synchronous>, transform_indices = @transform_0, window_bounds = array<i64: 16, 2, 64>}, {pipeline_mode = #tpu.pipeline_mode<synchronous>, transform_indices = @transform_1, window_bounds = array<i64: 64, 32>}, {pipeline_mode = #tpu.pipeline_mode<synchronous>, transform_indices = @transform_2, window_bounds = array<i64: 1, 32>}, {pipeline_mode = #tpu.pipeline_mode<synchronous>, transform_indices = @transform_3, window_bounds = array<i64: 4, 32, 256>}, {pipeline_mode = #tpu.pipeline_mode<synchronous>, transform_indices = @transform_4, window_bounds = array<i64: 1, 256>}, {pipeline_mode = #tpu.pipeline_mode<synchronous>, transform_indices = @transform_5, window_bounds = array<i64: 256, 256>}, {pipeline_mode = #tpu.pipeline_mode<synchronous>, transform_indices = @transform_6, window_bounds = array<i64: 1, 256>}, {pipeline_mode = #tpu.pipeline_mode<synchronous>, transform_indices = @transform_7, window_bounds = array<i64: 2, 256>}]} {
    %c0 = arith.constant 0 : index
    %c0_0 = arith.constant 0 : index
    %0 = vector.load %arg2[%c0, %c0_0] : memref<64x32xbf16, #tpu.memory_space<vmem>>, vector<64x32xbf16>
    %c0_1 = arith.constant 0 : index
    %c0_2 = arith.constant 0 : index
    %1 = vector.load %arg3[%c0_1, %c0_2] : memref<1x32xf32, #tpu.memory_space<vmem>>, vector<1x32xf32>
    %c0_3 = arith.constant 0 : index
    %c0_4 = arith.constant 0 : index
    %c0_5 = arith.constant 0 : index
    %2 = vector.load %arg1[%c0_3, %c0_4, %c0_5] : memref<16x2x64xbf16, #tpu.memory_space<vmem>>, vector<1x2x64xbf16>
    %3 = vector.shape_cast %2 : vector<1x2x64xbf16> to vector<2x64xbf16>
    %cst = arith.constant dense<0.000000e+00> : vector<2x32xf32>
    %4 = tpu.matmul %3, %0, %cst {dimension_numbers = #tpu.dot_dimension_numbers<[1], [0], [0], [1], [0, 0, 1, 1], [], []>} : vector<2x64xbf16>, vector<64x32xbf16>, vector<2x32xf32> -> vector<2x32xf32>
    %c1 = arith.constant 1 : index
    %c0_6 = arith.constant 0 : index
    %c0_7 = arith.constant 0 : index
    %5 = vector.load %arg1[%c1, %c0_6, %c0_7] : memref<16x2x64xbf16, #tpu.memory_space<vmem>>, vector<1x2x64xbf16>
    %6 = vector.shape_cast %5 : vector<1x2x64xbf16> to vector<2x64xbf16>
    %cst_8 = arith.constant dense<0.000000e+00> : vector<2x32xf32>
    %7 = tpu.matmul %6, %0, %cst_8 {dimension_numbers = #tpu.dot_dimension_numbers<[1], [0], [0], [1], [0, 0, 1, 1], [], []>} : vector<2x64xbf16>, vector<64x32xbf16>, vector<2x32xf32> -> vector<2x32xf32>
    %8 = arith.maximumf %4, %7 : vector<2x32xf32>
    %c2 = arith.constant 2 : index
    %c0_9 = arith.constant 0 : index
    %c0_10 = arith.constant 0 : index
    %9 = vector.load %arg1[%c2, %c0_9, %c0_10] : memref<16x2x64xbf16, #tpu.memory_space<vmem>>, vector<1x2x64xbf16>
    %10 = vector.shape_cast %9 : vector<1x2x64xbf16> to vector<2x64xbf16>
    %cst_11 = arith.constant dense<0.000000e+00> : vector<2x32xf32>
    %11 = tpu.matmul %10, %0, %cst_11 {dimension_numbers = #tpu.dot_dimension_numbers<[1], [0], [0], [1], [0, 0, 1, 1], [], []>} : vector<2x64xbf16>, vector<64x32xbf16>, vector<2x32xf32> -> vector<2x32xf32>
    %12 = arith.maximumf %8, %11 : vector<2x32xf32>
    %c3 = arith.constant 3 : index
    %c0_12 = arith.constant 0 : index
    %c0_13 = arith.constant 0 : index
    %13 = vector.load %arg1[%c3, %c0_12, %c0_13] : memref<16x2x64xbf16, #tpu.memory_space<vmem>>, vector<1x2x64xbf16>
    %14 = vector.shape_cast %13 : vector<1x2x64xbf16> to vector<2x64xbf16>
    %cst_14 = arith.constant dense<0.000000e+00> : vector<2x32xf32>
    %15 = tpu.matmul %14, %0, %cst_14 {dimension_numbers = #tpu.dot_dimension_numbers<[1], [0], [0], [1], [0, 0, 1, 1], [], []>} : vector<2x64xbf16>, vector<64x32xbf16>, vector<2x32xf32> -> vector<2x32xf32>
    %16 = arith.maximumf %12, %15 : vector<2x32xf32>
    %17 = vector.broadcast %1 : vector<1x32xf32> to vector<2x32xf32>
    %18 = arith.addf %16, %17 : vector<2x32xf32>
    %cst_15 = arith.constant 0.000000e+00 : f32
    %19 = vector.broadcast %cst_15 : f32 to vector<2x32xf32>
    %20 = arith.maximumf %18, %19 : vector<2x32xf32>
    %21 = arith.truncf %20 : vector<2x32xf32> to vector<2x32xbf16>
    %c0_16 = arith.constant 0 : index
    %c0_17 = arith.constant 0 : index
    %c0_18 = arith.constant 0 : index
    %22 = vector.load %arg4[%c0_16, %c0_17, %c0_18] : memref<4x32x256xbf16, #tpu.memory_space<vmem>>, vector<1x32x256xbf16>
    %23 = vector.shape_cast %22 : vector<1x32x256xbf16> to vector<32x256xbf16>
    %cst_19 = arith.constant dense<0.000000e+00> : vector<2x256xf32>
    %24 = tpu.matmul %21, %23, %cst_19 {dimension_numbers = #tpu.dot_dimension_numbers<[1], [0], [0], [1], [0, 0, 1, 1], [], []>} : vector<2x32xbf16>, vector<32x256xbf16>, vector<2x256xf32> -> vector<2x256xf32>
    %c4 = arith.constant 4 : index
    %c0_20 = arith.constant 0 : index
    %c0_21 = arith.constant 0 : index
    %25 = vector.load %arg1[%c4, %c0_20, %c0_21] : memref<16x2x64xbf16, #tpu.memory_space<vmem>>, vector<1x2x64xbf16>
    %26 = vector.shape_cast %25 : vector<1x2x64xbf16> to vector<2x64xbf16>
    %cst_22 = arith.constant dense<0.000000e+00> : vector<2x32xf32>
    %27 = tpu.matmul %26, %0, %cst_22 {dimension_numbers = #tpu.dot_dimension_numbers<[1], [0], [0], [1], [0, 0, 1, 1], [], []>} : vector<2x64xbf16>, vector<64x32xbf16>, vector<2x32xf32> -> vector<2x32xf32>
    %c5 = arith.constant 5 : index
    %c0_23 = arith.constant 0 : index
    %c0_24 = arith.constant 0 : index
    %28 = vector.load %arg1[%c5, %c0_23, %c0_24] : memref<16x2x64xbf16, #tpu.memory_space<vmem>>, vector<1x2x64xbf16>
    %29 = vector.shape_cast %28 : vector<1x2x64xbf16> to vector<2x64xbf16>
    %cst_25 = arith.constant dense<0.000000e+00> : vector<2x32xf32>
    %30 = tpu.matmul %29, %0, %cst_25 {dimension_numbers = #tpu.dot_dimension_numbers<[1], [0], [0], [1], [0, 0, 1, 1], [], []>} : vector<2x64xbf16>, vector<64x32xbf16>, vector<2x32xf32> -> vector<2x32xf32>
    %31 = arith.maximumf %27, %30 : vector<2x32xf32>
    %c6 = arith.constant 6 : index
    %c0_26 = arith.constant 0 : index
    %c0_27 = arith.constant 0 : index
    %32 = vector.load %arg1[%c6, %c0_26, %c0_27] : memref<16x2x64xbf16, #tpu.memory_space<vmem>>, vector<1x2x64xbf16>
    %33 = vector.shape_cast %32 : vector<1x2x64xbf16> to vector<2x64xbf16>
    %cst_28 = arith.constant dense<0.000000e+00> : vector<2x32xf32>
    %34 = tpu.matmul %33, %0, %cst_28 {dimension_numbers = #tpu.dot_dimension_numbers<[1], [0], [0], [1], [0, 0, 1, 1], [], []>} : vector<2x64xbf16>, vector<64x32xbf16>, vector<2x32xf32> -> vector<2x32xf32>
    %35 = arith.maximumf %31, %34 : vector<2x32xf32>
    %c7 = arith.constant 7 : index
    %c0_29 = arith.constant 0 : index
    %c0_30 = arith.constant 0 : index
    %36 = vector.load %arg1[%c7, %c0_29, %c0_30] : memref<16x2x64xbf16, #tpu.memory_space<vmem>>, vector<1x2x64xbf16>
    %37 = vector.shape_cast %36 : vector<1x2x64xbf16> to vector<2x64xbf16>
    %cst_31 = arith.constant dense<0.000000e+00> : vector<2x32xf32>
    %38 = tpu.matmul %37, %0, %cst_31 {dimension_numbers = #tpu.dot_dimension_numbers<[1], [0], [0], [1], [0, 0, 1, 1], [], []>} : vector<2x64xbf16>, vector<64x32xbf16>, vector<2x32xf32> -> vector<2x32xf32>
    %39 = arith.maximumf %35, %38 : vector<2x32xf32>
    %40 = vector.broadcast %1 : vector<1x32xf32> to vector<2x32xf32>
    %41 = arith.addf %39, %40 : vector<2x32xf32>
    %cst_32 = arith.constant 0.000000e+00 : f32
    %42 = vector.broadcast %cst_32 : f32 to vector<2x32xf32>
    %43 = arith.maximumf %41, %42 : vector<2x32xf32>
    %44 = arith.truncf %43 : vector<2x32xf32> to vector<2x32xbf16>
    %c1_33 = arith.constant 1 : index
    %c0_34 = arith.constant 0 : index
    %c0_35 = arith.constant 0 : index
    %45 = vector.load %arg4[%c1_33, %c0_34, %c0_35] : memref<4x32x256xbf16, #tpu.memory_space<vmem>>, vector<1x32x256xbf16>
    %46 = vector.shape_cast %45 : vector<1x32x256xbf16> to vector<32x256xbf16>
    %cst_36 = arith.constant dense<0.000000e+00> : vector<2x256xf32>
    %47 = tpu.matmul %44, %46, %cst_36 {dimension_numbers = #tpu.dot_dimension_numbers<[1], [0], [0], [1], [0, 0, 1, 1], [], []>} : vector<2x32xbf16>, vector<32x256xbf16>, vector<2x256xf32> -> vector<2x256xf32>
    %48 = arith.addf %24, %47 : vector<2x256xf32>
    %c8 = arith.constant 8 : index
    %c0_37 = arith.constant 0 : index
    %c0_38 = arith.constant 0 : index
    %49 = vector.load %arg1[%c8, %c0_37, %c0_38] : memref<16x2x64xbf16, #tpu.memory_space<vmem>>, vector<1x2x64xbf16>
    %50 = vector.shape_cast %49 : vector<1x2x64xbf16> to vector<2x64xbf16>
    %cst_39 = arith.constant dense<0.000000e+00> : vector<2x32xf32>
    %51 = tpu.matmul %50, %0, %cst_39 {dimension_numbers = #tpu.dot_dimension_numbers<[1], [0], [0], [1], [0, 0, 1, 1], [], []>} : vector<2x64xbf16>, vector<64x32xbf16>, vector<2x32xf32> -> vector<2x32xf32>
    %c9 = arith.constant 9 : index
    %c0_40 = arith.constant 0 : index
    %c0_41 = arith.constant 0 : index
    %52 = vector.load %arg1[%c9, %c0_40, %c0_41] : memref<16x2x64xbf16, #tpu.memory_space<vmem>>, vector<1x2x64xbf16>
    %53 = vector.shape_cast %52 : vector<1x2x64xbf16> to vector<2x64xbf16>
    %cst_42 = arith.constant dense<0.000000e+00> : vector<2x32xf32>
    %54 = tpu.matmul %53, %0, %cst_42 {dimension_numbers = #tpu.dot_dimension_numbers<[1], [0], [0], [1], [0, 0, 1, 1], [], []>} : vector<2x64xbf16>, vector<64x32xbf16>, vector<2x32xf32> -> vector<2x32xf32>
    %55 = arith.maximumf %51, %54 : vector<2x32xf32>
    %c10 = arith.constant 10 : index
    %c0_43 = arith.constant 0 : index
    %c0_44 = arith.constant 0 : index
    %56 = vector.load %arg1[%c10, %c0_43, %c0_44] : memref<16x2x64xbf16, #tpu.memory_space<vmem>>, vector<1x2x64xbf16>
    %57 = vector.shape_cast %56 : vector<1x2x64xbf16> to vector<2x64xbf16>
    %cst_45 = arith.constant dense<0.000000e+00> : vector<2x32xf32>
    %58 = tpu.matmul %57, %0, %cst_45 {dimension_numbers = #tpu.dot_dimension_numbers<[1], [0], [0], [1], [0, 0, 1, 1], [], []>} : vector<2x64xbf16>, vector<64x32xbf16>, vector<2x32xf32> -> vector<2x32xf32>
    %59 = arith.maximumf %55, %58 : vector<2x32xf32>
    %c11 = arith.constant 11 : index
    %c0_46 = arith.constant 0 : index
    %c0_47 = arith.constant 0 : index
    %60 = vector.load %arg1[%c11, %c0_46, %c0_47] : memref<16x2x64xbf16, #tpu.memory_space<vmem>>, vector<1x2x64xbf16>
    %61 = vector.shape_cast %60 : vector<1x2x64xbf16> to vector<2x64xbf16>
    %cst_48 = arith.constant dense<0.000000e+00> : vector<2x32xf32>
    %62 = tpu.matmul %61, %0, %cst_48 {dimension_numbers = #tpu.dot_dimension_numbers<[1], [0], [0], [1], [0, 0, 1, 1], [], []>} : vector<2x64xbf16>, vector<64x32xbf16>, vector<2x32xf32> -> vector<2x32xf32>
    %63 = arith.maximumf %59, %62 : vector<2x32xf32>
    %64 = vector.broadcast %1 : vector<1x32xf32> to vector<2x32xf32>
    %65 = arith.addf %63, %64 : vector<2x32xf32>
    %cst_49 = arith.constant 0.000000e+00 : f32
    %66 = vector.broadcast %cst_49 : f32 to vector<2x32xf32>
    %67 = arith.maximumf %65, %66 : vector<2x32xf32>
    %68 = arith.truncf %67 : vector<2x32xf32> to vector<2x32xbf16>
    %c2_50 = arith.constant 2 : index
    %c0_51 = arith.constant 0 : index
    %c0_52 = arith.constant 0 : index
    %69 = vector.load %arg4[%c2_50, %c0_51, %c0_52] : memref<4x32x256xbf16, #tpu.memory_space<vmem>>, vector<1x32x256xbf16>
    %70 = vector.shape_cast %69 : vector<1x32x256xbf16> to vector<32x256xbf16>
    %cst_53 = arith.constant dense<0.000000e+00> : vector<2x256xf32>
    %71 = tpu.matmul %68, %70, %cst_53 {dimension_numbers = #tpu.dot_dimension_numbers<[1], [0], [0], [1], [0, 0, 1, 1], [], []>} : vector<2x32xbf16>, vector<32x256xbf16>, vector<2x256xf32> -> vector<2x256xf32>
    %72 = arith.addf %48, %71 : vector<2x256xf32>
    %c12 = arith.constant 12 : index
    %c0_54 = arith.constant 0 : index
    %c0_55 = arith.constant 0 : index
    %73 = vector.load %arg1[%c12, %c0_54, %c0_55] : memref<16x2x64xbf16, #tpu.memory_space<vmem>>, vector<1x2x64xbf16>
    %74 = vector.shape_cast %73 : vector<1x2x64xbf16> to vector<2x64xbf16>
    %cst_56 = arith.constant dense<0.000000e+00> : vector<2x32xf32>
    %75 = tpu.matmul %74, %0, %cst_56 {dimension_numbers = #tpu.dot_dimension_numbers<[1], [0], [0], [1], [0, 0, 1, 1], [], []>} : vector<2x64xbf16>, vector<64x32xbf16>, vector<2x32xf32> -> vector<2x32xf32>
    %c13 = arith.constant 13 : index
    %c0_57 = arith.constant 0 : index
    %c0_58 = arith.constant 0 : index
    %76 = vector.load %arg1[%c13, %c0_57, %c0_58] : memref<16x2x64xbf16, #tpu.memory_space<vmem>>, vector<1x2x64xbf16>
    %77 = vector.shape_cast %76 : vector<1x2x64xbf16> to vector<2x64xbf16>
    %cst_59 = arith.constant dense<0.000000e+00> : vector<2x32xf32>
    %78 = tpu.matmul %77, %0, %cst_59 {dimension_numbers = #tpu.dot_dimension_numbers<[1], [0], [0], [1], [0, 0, 1, 1], [], []>} : vector<2x64xbf16>, vector<64x32xbf16>, vector<2x32xf32> -> vector<2x32xf32>
    %79 = arith.maximumf %75, %78 : vector<2x32xf32>
    %c14 = arith.constant 14 : index
    %c0_60 = arith.constant 0 : index
    %c0_61 = arith.constant 0 : index
    %80 = vector.load %arg1[%c14, %c0_60, %c0_61] : memref<16x2x64xbf16, #tpu.memory_space<vmem>>, vector<1x2x64xbf16>
    %81 = vector.shape_cast %80 : vector<1x2x64xbf16> to vector<2x64xbf16>
    %cst_62 = arith.constant dense<0.000000e+00> : vector<2x32xf32>
    %82 = tpu.matmul %81, %0, %cst_62 {dimension_numbers = #tpu.dot_dimension_numbers<[1], [0], [0], [1], [0, 0, 1, 1], [], []>} : vector<2x64xbf16>, vector<64x32xbf16>, vector<2x32xf32> -> vector<2x32xf32>
    %83 = arith.maximumf %79, %82 : vector<2x32xf32>
    %c15 = arith.constant 15 : index
    %c0_63 = arith.constant 0 : index
    %c0_64 = arith.constant 0 : index
    %84 = vector.load %arg1[%c15, %c0_63, %c0_64] : memref<16x2x64xbf16, #tpu.memory_space<vmem>>, vector<1x2x64xbf16>
    %85 = vector.shape_cast %84 : vector<1x2x64xbf16> to vector<2x64xbf16>
    %cst_65 = arith.constant dense<0.000000e+00> : vector<2x32xf32>
    %86 = tpu.matmul %85, %0, %cst_65 {dimension_numbers = #tpu.dot_dimension_numbers<[1], [0], [0], [1], [0, 0, 1, 1], [], []>} : vector<2x64xbf16>, vector<64x32xbf16>, vector<2x32xf32> -> vector<2x32xf32>
    %87 = arith.maximumf %83, %86 : vector<2x32xf32>
    %88 = vector.broadcast %1 : vector<1x32xf32> to vector<2x32xf32>
    %89 = arith.addf %87, %88 : vector<2x32xf32>
    %cst_66 = arith.constant 0.000000e+00 : f32
    %90 = vector.broadcast %cst_66 : f32 to vector<2x32xf32>
    %91 = arith.maximumf %89, %90 : vector<2x32xf32>
    %92 = arith.truncf %91 : vector<2x32xf32> to vector<2x32xbf16>
    %c3_67 = arith.constant 3 : index
    %c0_68 = arith.constant 0 : index
    %c0_69 = arith.constant 0 : index
    %93 = vector.load %arg4[%c3_67, %c0_68, %c0_69] : memref<4x32x256xbf16, #tpu.memory_space<vmem>>, vector<1x32x256xbf16>
    %94 = vector.shape_cast %93 : vector<1x32x256xbf16> to vector<32x256xbf16>
    %cst_70 = arith.constant dense<0.000000e+00> : vector<2x256xf32>
    %95 = tpu.matmul %92, %94, %cst_70 {dimension_numbers = #tpu.dot_dimension_numbers<[1], [0], [0], [1], [0, 0, 1, 1], [], []>} : vector<2x32xbf16>, vector<32x256xbf16>, vector<2x256xf32> -> vector<2x256xf32>
    %96 = arith.addf %72, %95 : vector<2x256xf32>
    %c0_71 = arith.constant 0 : index
    %c0_72 = arith.constant 0 : index
    %97 = vector.load %arg5[%c0_71, %c0_72] : memref<1x256xf32, #tpu.memory_space<vmem>>, vector<1x256xf32>
    %98 = vector.broadcast %97 : vector<1x256xf32> to vector<2x256xf32>
    %99 = arith.addf %96, %98 : vector<2x256xf32>
    %cst_73 = arith.constant 0.000000e+00 : f32
    %100 = vector.broadcast %cst_73 : f32 to vector<2x256xf32>
    %101 = arith.maximumf %99, %100 : vector<2x256xf32>
    %102 = arith.truncf %101 : vector<2x256xf32> to vector<2x256xbf16>
    %c0_74 = arith.constant 0 : index
    %c0_75 = arith.constant 0 : index
    %103 = vector.load %arg6[%c0_74, %c0_75] : memref<256x256xbf16, #tpu.memory_space<vmem>>, vector<256x256xbf16>
    %cst_76 = arith.constant dense<0.000000e+00> : vector<2x256xf32>
    %104 = tpu.matmul %102, %103, %cst_76 {dimension_numbers = #tpu.dot_dimension_numbers<[1], [0], [0], [1], [0, 0, 1, 1], [], []>} : vector<2x256xbf16>, vector<256x256xbf16>, vector<2x256xf32> -> vector<2x256xf32>
    %c0_77 = arith.constant 0 : index
    %c0_78 = arith.constant 0 : index
    %105 = vector.load %arg7[%c0_77, %c0_78] : memref<1x256xf32, #tpu.memory_space<vmem>>, vector<1x256xf32>
    %106 = vector.broadcast %105 : vector<1x256xf32> to vector<2x256xf32>
    %107 = arith.addf %104, %106 : vector<2x256xf32>
    %cst_79 = arith.constant 0.000000e+00 : f32
    %108 = vector.broadcast %cst_79 : f32 to vector<2x256xf32>
    %109 = arith.maximumf %107, %108 : vector<2x256xf32>
    %c0_80 = arith.constant 0 : index
    %c0_81 = arith.constant 0 : index
    %110 = vector.load %arg8[%c0_80, %c0_81] : memref<2x256xf32, #tpu.memory_space<vmem>>, vector<2x256xf32>
    tpu.vector_store %arg8[%c0_80, %c0_81], %109 {strides = array<i32>} : memref<2x256xf32, #tpu.memory_space<vmem>>, vector<2x256xf32>,
    return
  }
  func.func @transform_0(%arg0: i32) -> (i32, i32, i32) {
    %c0_i32 = arith.constant 0 : i32
    %c0_i32_0 = arith.constant 0 : i32
    %c0_i32_1 = arith.constant 0 : i32
    %c0_i32_2 = arith.constant 0 : i32
    return %c0_i32, %c0_i32_0, %c0_i32_1 : i32, i32, i32
  }
  func.func @transform_1(%arg0: i32) -> (i32, i32) {
    %c0_i32 = arith.constant 0 : i32
    %c0_i32_0 = arith.constant 0 : i32
    %c0_i32_1 = arith.constant 0 : i32
    return %c0_i32, %c0_i32_0 : i32, i32
  }
  func.func @transform_2(%arg0: i32) -> (i32, i32) {
    %c0_i32 = arith.constant 0 : i32
    %c0_i32_0 = arith.constant 0 : i32
    %c0_i32_1 = arith.constant 0 : i32
    return %c0_i32, %c0_i32_0 : i32, i32
  }
  func.func @transform_3(%arg0: i32) -> (i32, i32, i32) {
    %c0_i32 = arith.constant 0 : i32
    %c0_i32_0 = arith.constant 0 : i32
    %c0_i32_1 = arith.constant 0 : i32
    %c0_i32_2 = arith.constant 0 : i32
    return %c0_i32, %c0_i32_0, %c0_i32_1 : i32, i32, i32
  }
  func.func @transform_4(%arg0: i32) -> (i32, i32) {
    %c0_i32 = arith.constant 0 : i32
    %c0_i32_0 = arith.constant 0 : i32
    %c0_i32_1 = arith.constant 0 : i32
    return %c0_i32, %c0_i32_0 : i32, i32
  }
  func.func @transform_5(%arg0: i32) -> (i32, i32) {
    %c0_i32 = arith.constant 0 : i32
    %c0_i32_0 = arith.constant 0 : i32
    %c0_i32_1 = arith.constant 0 : i32
    return %c0_i32, %c0_i32_0 : i32, i32
  }
  func.func @transform_6(%arg0: i32) -> (i32, i32) {
    %c0_i32 = arith.constant 0 : i32
    %c0_i32_0 = arith.constant 0 : i32
    %c0_i32_1 = arith.constant 0 : i32
    return %c0_i32, %c0_i32_0 : i32, i32
  }
  func.func @transform_7(%arg0: i32) -> (i32, i32) {
    %c0_i32 = arith.constant 0 : i32
    %c0_i32_0 = arith.constant 0 : i32
    %c0_i32_1 = arith.constant 0 : i32
    return %c0_i32, %c0_i32_0 : i32, i32
  }
}

</mosaic_0001>

<bundles_post_ra>
// kernel: alexnet_feature_forward.3
= control target key start
LH: loop header
LB: loop body
LE: loop exit
PB: predicated region body
PF: predicated region fallthrough
CT: control target
= control target key end

     0   :  { %v840_v3 = vmov 0   ;;  %vm400_vm0 = vcmask 523264   ;;  %s1098_s0 = inlined_call_operand.vmem [shape: bf16[64,2048], index: 0, kind: input, shape index: {}]   ;;  %s1099_s1 = inlined_call_operand.vmem [shape: bf16[8,64], index: 1, kind: input, shape index: {}]   ;;  %s1100_s2 = inlined_call_operand.vmem [shape: f32[8,1], index: 2, kind: input, shape index: {}]   ;;  %s1101_s3 = inlined_call_operand.vmem [shape: f32[8,512], index: 3, kind: output, shape index: {}]  }
   0x1   :  { %v64_v0 = vld [vmem:[%s1098_s0 + $0x180] sm:$0xff]  ;;  %v65_v2 = vld [vmem:[%s1098_s0 + $0x188] sm:$0xff]  ;;  %436 = vmatprep.mubr.bf16.mxu0 %v840_v3  ;;  %477 = vmatprep.mubr.bf16.mxu1 %v840_v3  ;;  %v66_v31 = vld [vmem:[%s1098_s0 + $0x190] sm:$0xff] }
   0x2   :  { %v72_v1 = vld [vmem:[%s1098_s0 + $0x1c0] sm:$0xff]  ;;  %v73_v5 = vld [vmem:[%s1098_s0 + $0x1c8] sm:$0xff]  ;;  %839 = vset.pattern.permute.xlu0 %v840_v3  ;;  %v74_v32 = vld [vmem:[%s1098_s0 + $0x1d0] sm:$0xff] }
   0x3   :  { %v815_v4 = vcombine.high %v64_v0, %v72_v1  ;;  %v814_v6 = vcombine.low %v64_v0, %v72_v1  ;;  %v48_v7 = vld [vmem:[%s1098_s0 + $0x100] sm:$0xff]  ;;  %v817_v9 = vcombine.high %v65_v2, %v73_v5  ;;  %v816_v10 = vcombine.low %v65_v2, %v73_v5  ;;  %v49_v12 = vld [vmem:[%s1098_s0 + $0x108] sm:$0xff]  ;;  %v67_v33 = vld [vmem:[%s1098_s0 + $0x198] sm:$0xff] }
   0x4   :  { %v56_v8 = vld [vmem:[%s1098_s0 + $0x140] sm:$0xff]  ;;  %v57_v13 = vld [vmem:[%s1098_s0 + $0x148] sm:$0xff]  ;;  %v75_v34 = vld [vmem:[%s1098_s0 + $0x1d8] sm:$0xff]  ;;  %v819_v37 = vcombine.high %v66_v31, %v74_v32  ;;  %v818_v44 = vcombine.low %v66_v31, %v74_v32 }
   0x5   :  { %v799_v11 = vcombine.high %v48_v7, %v56_v8  ;;  %v32_v14 = vld [vmem:[%s1098_s0 + $0x80] sm:$0xff]  ;;  %412 = vmatprep.subr.bf16.mxu0 %v815_v4  ;;  %v801_v15 = vcombine.high %v49_v12, %v57_v13  ;;  %v33_v17 = vld [vmem:[%s1098_s0 + $0x88] sm:$0xff]  ;;  %453 = vmatprep.subr.bf16.mxu1 %v817_v9  ;;  %v798_v19 = vcombine.low %v48_v7, %v56_v8  ;;  %v50_v39 = vld [vmem:[%s1098_s0 + $0x110] sm:$0xff] }
   0x6   :  { %v40_v16 = vld [vmem:[%s1098_s0 + $0xc0] sm:$0xff]  ;;  %v41_v18 = vld [vmem:[%s1098_s0 + $0xc8] sm:$0xff]  ;;  %413 = vmatpush1.bf16.msra.mxu0 %v814_v6  ;;  %454 = vmatpush1.bf16.msra.mxu1 %v816_v10  ;;  %v800_v20 = vcombine.low %v49_v12, %v57_v13  ;;  %v821_v38 = vcombine.high %v67_v33, %v75_v34  ;;  %v58_v40 = vld [vmem:[%s1098_s0 + $0x150] sm:$0xff]  ;;  %v820_v45 = vcombine.low %v67_v33, %v75_v34 }
   0x7   :  { %414 = vmatprep.subr.bf16.mxu0 %v799_v11  ;;  %v783_v21 = vcombine.high %v32_v14, %v40_v16  ;;  %455 = vmatprep.subr.bf16.mxu1 %v801_v15  ;;  %v785_v22 = vcombine.high %v33_v17, %v41_v18  ;;  %v16_v23 = vld [vmem:[%s1098_s0] sm:$0xff]  ;;  %v17_v25 = vld [vmem:[%s1098_s0 + $0x8] sm:$0xff]  ;;  %v782_v27 = vcombine.low %v32_v14, %v40_v16  ;;  %v51_v41 = vld [vmem:[%s1098_s0 + $0x118] sm:$0xff] }
   0x8   :  { %v24_v24 = vld [vmem:[%s1098_s0 + $0x40] sm:$0xff]  ;;  %v25_v26 = vld [vmem:[%s1098_s0 + $0x48] sm:$0xff]  ;;  %v784_v28 = vcombine.low %v33_v17, %v41_v18  ;;  %v59_v42 = vld [vmem:[%s1098_s0 + $0x158] sm:$0xff]  ;;  %v803_v46 = vcombine.high %v50_v39, %v58_v40  ;;  %v802_v52 = vcombine.low %v50_v39, %v58_v40 }
   0x9   :  { %v767_v29 = vcombine.high %v16_v23, %v24_v24  ;;  %v769_v30 = vcombine.high %v17_v25, %v25_v26  ;;  %v766_v35 = vcombine.low %v16_v23, %v24_v24  ;;  %v768_v36 = vcombine.low %v17_v25, %v25_v26  ;;  %v939_v43 = vld [vmem:[%s1099_s1] sm:$0xf]  ;;  %v34_v48 = vld [vmem:[%s1098_s0 + $0x90] sm:$0xff]  ;;  %v35_v50 = vld [vmem:[%s1098_s0 + $0x98] sm:$0xff] }
   0xa   :  { %415 = vmatpush1.bf16.msra.mxu0 %v798_v19  ;;  %456 = vmatpush1.bf16.msra.mxu1 %v800_v20  ;;  %v805_v47 = vcombine.high %v51_v41, %v59_v42  ;;  %v42_v49 = vld [vmem:[%s1098_s0 + $0xd0] sm:$0xff]  ;;  %v43_v51 = vld [vmem:[%s1098_s0 + $0xd8] sm:$0xff]  ;;  %v804_v53 = vcombine.low %v51_v41, %v59_v42  ;;  %v744_v55 = vld [vmem:[%s1100_s2] sm:$0xff] }
   0xb   :  { %416 = vmatprep.subr.bf16.mxu0 %v783_v21  ;;  %457 = vmatprep.subr.bf16.mxu1 %v785_v22  ;;  %v787_v54 = vcombine.high %v34_v48, %v42_v49  ;;  %v789_v56 = vcombine.high %v35_v50, %v43_v51  ;;  %v18_v57 = vld [vmem:[%s1098_s0 + $0x10] sm:$0xff]  ;;  %v19_v59 = vld [vmem:[%s1098_s0 + $0x18] sm:$0xff]  ;;  %v786_v61 = vcombine.low %v34_v48, %v42_v49  ;;  %v68_v1 = vld [vmem:[%s1098_s0 + $0x1a0] sm:$0xff] }
   0xc   :  { %v26_v58 = vld [vmem:[%s1098_s0 + $0x50] sm:$0xff]  ;;  %v27_v60 = vld [vmem:[%s1098_s0 + $0x58] sm:$0xff]  ;;  %747 = vperm.xlu0 %839, %v744_v55   ;;  %v788_v62 = vcombine.low %v35_v50, %v43_v51  ;;  %v76_v2 = vld [vmem:[%s1098_s0 + $0x1e0] sm:$0xff] }
   0xd   :  { %v771_v63 = vcombine.high %v18_v57, %v26_v58  ;;  %v773_v0 = vcombine.high %v19_v59, %v27_v60  ;;  %v69_v4 = vld [vmem:[%s1098_s0 + $0x1a8] sm:$0xff]  ;;  %v770_v6 = vcombine.low %v18_v57, %v26_v58  ;;  %v772_v7 = vcombine.low %v19_v59, %v27_v60  ;;  %v52_v10 = vld [vmem:[%s1098_s0 + $0x120] sm:$0xff]  ;;  %v70_v34 = vld [vmem:[%s1098_s0 + $0x1b0] sm:$0xff] }
   0xe   :  { %417 = vmatpush1.bf16.msra.mxu0 %v782_v27  ;;  %458 = vmatpush1.bf16.msra.mxu1 %v784_v28  ;;  %v77_v5 = vld [vmem:[%s1098_s0 + $0x1e8] sm:$0xff]  ;;  %v823_v8 = vcombine.high %v68_v1, %v76_v2  ;;  %v60_v11 = vld [vmem:[%s1098_s0 + $0x160] sm:$0xff]  ;;  %v822_v14 = vcombine.low %v68_v1, %v76_v2  ;;  %v54_v42 = vld [vmem:[%s1098_s0 + $0x130] sm:$0xff] }
   0xf   :  { %418 = vmatprep.subr.bf16.mxu0 %v767_v29  ;;  %459 = vmatprep.subr.bf16.mxu1 %v769_v30  ;;  %v825_v9 = vcombine.high %v69_v4, %v77_v5  ;;  %v53_v12 = vld [vmem:[%s1098_s0 + $0x128] sm:$0xff]  ;;  %v824_v15 = vcombine.low %v69_v4, %v77_v5  ;;  %v807_v16 = vcombine.high %v52_v10, %v60_v11  ;;  %v36_v18 = vld [vmem:[%s1098_s0 + $0xa0] sm:$0xff]  ;;  %v38_v51 = vld [vmem:[%s1098_s0 + $0xb0] sm:$0xff] }
  0x10   :  { %v61_v13 = vld [vmem:[%s1098_s0 + $0x168] sm:$0xff]  ;;  %v44_v19 = vld [vmem:[%s1098_s0 + $0xe0] sm:$0xff]  ;;  %v806_v22 = vcombine.low %v52_v10, %v60_v11  ;;  %v22_v59 = vld [vmem:[%s1098_s0 + $0x30] sm:$0xff] }
  0x11   :  { %v809_v17 = vcombine.high %v53_v12, %v61_v13  ;;  %v37_v20 = vld [vmem:[%s1098_s0 + $0xa8] sm:$0xff]  ;;  %v808_v23 = vcombine.low %v53_v12, %v61_v13  ;;  %v791_v24 = vcombine.high %v36_v18, %v44_v19  ;;  %v20_v26 = vld [vmem:[%s1098_s0 + $0x20] sm:$0xff]  ;;  %v790_v30 = vcombine.low %v36_v18, %v44_v19  ;;  %v30_v60 = vld [vmem:[%s1098_s0 + $0x70] sm:$0xff] }
  0x12   :  { %419 = vmatpush1.bf16.msra.mxu0 %v766_v35  ;;  %460 = vmatpush1.bf16.msra.mxu1 %v768_v36  ;;  %v45_v21 = vld [vmem:[%s1098_s0 + $0xe8] sm:$0xff]  ;;  %v28_v27 = vld [vmem:[%s1098_s0 + $0x60] sm:$0xff]  ;;  %v78_v35 = vld [vmem:[%s1098_s0 + $0x1f0] sm:$0xff]  ;;  %v779_v1 = vcombine.high %v22_v59, %v30_v60  ;;  %v778_v4 = vcombine.low %v22_v59, %v30_v60 }
  0x13   :  { %494 = vmatprep.subr.bf16.mxu0 %v819_v37  ;;  %535 = vmatprep.subr.bf16.mxu1 %v821_v38  ;;  %v793_v25 = vcombine.high %v37_v20, %v45_v21  ;;  %v21_v28 = vld [vmem:[%s1098_s0 + $0x28] sm:$0xff]  ;;  %v792_v31 = vcombine.low %v37_v20, %v45_v21  ;;  %v775_v32 = vcombine.high %v20_v26, %v28_v27  ;;  %v71_v36 = vld [vmem:[%s1098_s0 + $0x1b8] sm:$0xff] }
  0x14   :  { %v29_v29 = vld [vmem:[%s1098_s0 + $0x68] sm:$0xff]  ;;  %v79_v37 = vld [vmem:[%s1098_s0 + $0x1f8] sm:$0xff]  ;;  %v774_v38 = vcombine.low %v20_v26, %v28_v27  ;;  %v827_v40 = vcombine.high %v70_v34, %v78_v35 }
  0x15   :  { %830 = vmatmul.mubr.msk.bf16.vlgmr.msra.gmra.mxu0 %vm400_vm0, %v939_v43  ;;  %831 = vmatmul.mubr.msk.bf16.vlgmr.msra.gmra.mxu1 %vm400_vm0, %v939_v43  ;;  %v777_v33 = vcombine.high %v21_v28, %v29_v29  ;;  %v776_v39 = vcombine.low %v21_v28, %v29_v29  ;;  %v829_v41 = vcombine.high %v71_v36, %v79_v37 }
  0x16   :  { %495 = vmatpush1.bf16.msra.mxu0 %v818_v44  ;;  %536 = vmatpush1.bf16.msra.mxu1 %v820_v45  ;;  %v62_v44 = vld [vmem:[%s1098_s0 + $0x170] sm:$0xff]  ;;  %v55_v45 = vld [vmem:[%s1098_s0 + $0x138] sm:$0xff]  ;;  %v828_v48 = vcombine.low %v71_v36, %v79_v37 }
  0x17   :  { %496 = vmatprep.subr.bf16.mxu0 %v803_v46  ;;  %537 = vmatprep.subr.bf16.mxu1 %v805_v47  ;;  %v63_v46 = vld [vmem:[%s1098_s0 + $0x178] sm:$0xff]  ;;  %v826_v47 = vcombine.low %v70_v34, %v78_v35  ;;  %v811_v49 = vcombine.high %v54_v42, %v62_v44  ;;  %v810_v55 = vcombine.low %v54_v42, %v62_v44 }
  0x18   :  { %518 = vmatprep.mubr.bf16.mxu0 %v840_v3  ;;  %559 = vmatprep.mubr.bf16.mxu1 %v840_v3  ;;  %v813_v50 = vcombine.high %v55_v45, %v63_v46 }
  0x1a   :  { %497 = vmatpush1.bf16.msra.mxu0 %v802_v52  ;;  %538 = vmatpush1.bf16.msra.mxu1 %v804_v53  ;;  %v46_v52 = vld [vmem:[%s1098_s0 + $0xf0] sm:$0xff]  ;;  %v39_v53 = vld [vmem:[%s1098_s0 + $0xb8] sm:$0xff] }
  0x1b   :  { %498 = vmatprep.subr.bf16.mxu0 %v787_v54  ;;  %539 = vmatprep.subr.bf16.mxu1 %v789_v56  ;;  %v47_v54 = vld [vmem:[%s1098_s0 + $0xf8] sm:$0xff]  ;;  %v812_v56 = vcombine.low %v55_v45, %v63_v46  ;;  %v795_v57 = vcombine.high %v38_v51, %v46_v52 }
  0x1c   :  { %v797_v58 = vcombine.high %v39_v53, %v47_v54 }
  0x1e   :  { %499 = vmatpush1.bf16.msra.mxu0 %v786_v61  ;;  %540 = vmatpush1.bf16.msra.mxu1 %v788_v62  ;;  %v23_v61 = vld [vmem:[%s1098_s0 + $0x38] sm:$0xff] }
  0x1f   :  { %500 = vmatprep.subr.bf16.mxu0 %v771_v63  ;;  %541 = vmatprep.subr.bf16.mxu1 %v773_v0  ;;  %v31_v62 = vld [vmem:[%s1098_s0 + $0x78] sm:$0xff]  ;;  %v794_v63 = vcombine.low %v38_v51, %v46_v52  ;;  %v796_v0 = vcombine.low %v39_v53, %v47_v54 }
  0x20   :  { %v781_v2 = vcombine.high %v23_v61, %v31_v62  ;;  %v780_v5 = vcombine.low %v23_v61, %v31_v62 }
  0x22   :  { %501 = vmatpush1.bf16.msra.mxu0 %v770_v6  ;;  %542 = vmatpush1.bf16.msra.mxu1 %v772_v7 }
  0x23   :  { %576 = vmatprep.subr.bf16.mxu0 %v823_v8  ;;  %617 = vmatprep.subr.bf16.mxu1 %v825_v9 }
  0x25   :  { %832 = vmatmul.mubr.msk.bf16.vlgmr.msra.gmra.mxu0 %vm400_vm0, %v939_v43  ;;  %833 = vmatmul.mubr.msk.bf16.vlgmr.msra.gmra.mxu1 %vm400_vm0, %v939_v43 }
  0x26   :  { %577 = vmatpush1.bf16.msra.mxu0 %v822_v14  ;;  %618 = vmatpush1.bf16.msra.mxu1 %v824_v15 }
  0x27   :  { %578 = vmatprep.subr.bf16.mxu0 %v807_v16  ;;  %619 = vmatprep.subr.bf16.mxu1 %v809_v17 }
  0x28   :  { %600 = vmatprep.mubr.bf16.mxu0 %v840_v3  ;;  %641 = vmatprep.mubr.bf16.mxu1 %v840_v3 }
  0x2a   :  { %579 = vmatpush1.bf16.msra.mxu0 %v806_v22  ;;  %620 = vmatpush1.bf16.msra.mxu1 %v808_v23 }
  0x2b   :  { %580 = vmatprep.subr.bf16.mxu0 %v791_v24  ;;  %621 = vmatprep.subr.bf16.mxu1 %v793_v25 }
  0x2e   :  { %581 = vmatpush1.bf16.msra.mxu0 %v790_v30  ;;  %622 = vmatpush1.bf16.msra.mxu1 %v792_v31 }
  0x2f   :  { %582 = vmatprep.subr.bf16.mxu0 %v775_v32  ;;  %623 = vmatprep.subr.bf16.mxu1 %v777_v33 }
  0x32   :  { %583 = vmatpush1.bf16.msra.mxu0 %v774_v38  ;;  %624 = vmatpush1.bf16.msra.mxu1 %v776_v39 }
  0x33   :  { %658 = vmatprep.subr.bf16.mxu0 %v827_v40  ;;  %699 = vmatprep.subr.bf16.mxu1 %v829_v41 }
  0x35   :  { %834 = vmatmul.mubr.msk.bf16.vlgmr.msra.gmra.mxu0 %vm400_vm0, %v939_v43  ;;  %835 = vmatmul.mubr.msk.bf16.vlgmr.msra.gmra.mxu1 %vm400_vm0, %v939_v43 }
  0x36   :  { %659 = vmatpush1.bf16.msra.mxu0 %v826_v47  ;;  %700 = vmatpush1.bf16.msra.mxu1 %v828_v48 }
  0x37   :  { %660 = vmatprep.subr.bf16.mxu0 %v811_v49  ;;  %701 = vmatprep.subr.bf16.mxu1 %v813_v50 }
  0x38   :  { %682 = vmatprep.mubr.bf16.mxu0 %v840_v3  ;;  %723 = vmatprep.mubr.bf16.mxu1 %v840_v3 }
  0x3a   :  { %661 = vmatpush1.bf16.msra.mxu0 %v810_v55  ;;  %702 = vmatpush1.bf16.msra.mxu1 %v812_v56 }
  0x3b   :  { %662 = vmatprep.subr.bf16.mxu0 %v795_v57  ;;  %703 = vmatprep.subr.bf16.mxu1 %v797_v58 }
  0x3e   :  { %663 = vmatpush1.bf16.msra.mxu0 %v794_v63  ;;  %704 = vmatpush1.bf16.msra.mxu1 %v796_v0 }
  0x3f   :  { %664 = vmatprep.subr.bf16.mxu0 %v779_v1  ;;  %705 = vmatprep.subr.bf16.mxu1 %v781_v2 }
  0x42   :  { %665 = vmatpush1.bf16.msra.mxu0 %v778_v4  ;;  %706 = vmatpush1.bf16.msra.mxu1 %v780_v5 }
  0x45   :  { %836 = vmatmul.mubr.msk.bf16.vlgmr.msra.gmra.mxu0 %vm400_vm0, %v939_v43  ;;  %837 = vmatmul.mubr.msk.bf16.vlgmr.msra.gmra.mxu1 %vm400_vm0, %v939_v43 }
  0x87   :  { %v748_v35 = vpop.permute.xlu0 %747 }
  0xd5   :  { %v438_v3 = vpop.f32.mrf.mxu0  ;;  %v479_v6 = vpop.f32.mrf.mxu1 }
  0xd7   :  { %v440_v7 = vpop.f32.mrf.mxu0  ;;  %v481_v8 = vpop.f32.mrf.mxu1 }
  0xd9   :  { %v442_v9 = vpop.f32.mrf.mxu0  ;;  %v483_v10 = vpop.f32.mrf.mxu1 }
  0xdb   :  { %v443_v11 = vpop.f32.mrf.mxu0  ;;  %v484_v12 = vpop.f32.mrf.mxu1 }
  0xe5   :  { %v520_v13 = vpop.f32.mrf.mxu0  ;;  %v561_v14 = vpop.f32.mrf.mxu1 }
  0xe6   :  { %v732_v29 = vmax.f32 %v438_v3, %v520_v13  ;;  %v734_v32 = vmax.f32 %v479_v6, %v561_v14 }
  0xe7   :  { %v522_v15 = vpop.f32.mrf.mxu0  ;;  %v563_v16 = vpop.f32.mrf.mxu1 }
  0xe8   :  { %v733_v36 = vmax.f32 %v440_v7, %v522_v15  ;;  %v735_v40 = vmax.f32 %v481_v8, %v563_v16 }
  0xe9   :  { %v524_v17 = vpop.f32.mrf.mxu0  ;;  %v565_v18 = vpop.f32.mrf.mxu1 }
  0xeb   :  { %v525_v19 = vpop.f32.mrf.mxu0  ;;  %v566_v20 = vpop.f32.mrf.mxu1 }
  0xf5   :  { %v602_v21 = vpop.f32.mrf.mxu0  ;;  %v643_v22 = vpop.f32.mrf.mxu1 }
  0xf7   :  { %v604_v23 = vpop.f32.mrf.mxu0  ;;  %v645_v43 = vpop.f32.mrf.mxu1 }
  0xf9   :  { %v606_v24 = vpop.f32.mrf.mxu0  ;;  %v647_v25 = vpop.f32.mrf.mxu1 }
  0xfb   :  { %v607_v26 = vpop.f32.mrf.mxu0  ;;  %v648_v27 = vpop.f32.mrf.mxu1 }
 0x105   :  { %v684_v28 = vpop.f32.mrf.mxu0  ;;  %v725_v31 = vpop.f32.mrf.mxu1 }
 0x106   :  { %v736_v30 = vmax.f32 %v602_v21, %v684_v28  ;;  %v738_v33 = vmax.f32 %v643_v22, %v725_v31 }
 0x107   :  { %v686_v34 = vpop.f32.mrf.mxu0  ;;  %v727_v39 = vpop.f32.mrf.mxu1 }
 0x108   :  { %v740_v37 = vmax.f32 %v732_v29, %v736_v30  ;;  %v737_v38 = vmax.f32 %v604_v23, %v686_v34  ;;  %v742_v41 = vmax.f32 %v734_v32, %v738_v33  ;;  %v739_v42 = vmax.f32 %v645_v43, %v727_v39 }
 0x109   :  { %v688_v44 = vpop.f32.mrf.mxu0  ;;  %v729_v47 = vpop.f32.mrf.mxu1 }
 0x10a   :  { %v741_v45 = vmax.f32 %v733_v36, %v737_v38  ;;  %v750_v46 = vadd.f32 %v748_v35, %v740_v37  ;;  %v743_v48 = vmax.f32 %v735_v40, %v739_v42  ;;  %v752_v49 = vadd.f32 %v748_v35, %v742_v41 }
 0x10b   :  { %v689_v50 = vpop.f32.mrf.mxu0  ;;  %v730_v53 = vpop.f32.mrf.mxu1 }
 0x10c   :  { %v751_v51 = vadd.f32 %v748_v35, %v741_v45  ;;  %v754_v52 = vmax.f32 %v750_v46, 0.0  ;;  %v753_v54 = vadd.f32 %v748_v35, %v743_v48  ;;  %v756_v55 = vmax.f32 %v752_v49, 0.0 }
 0x10e   :  { %v755_v56 = vmax.f32 %v751_v51, 0.0  ;;  %758 = vst [vmem:[%s1101_s3] sm:$0xff] %v754_v52  ;;  %v757_v57 = vmax.f32 %v753_v54, 0.0  ;;  %760 = vst [vmem:[%s1101_s3 + $0x10] sm:$0xff] %v756_v55 }
 0x110   :  { %759 = vst [vmem:[%s1101_s3 + $0x8] sm:$0xff] %v755_v56  ;;  %761 = vst [vmem:[%s1101_s3 + $0x18] sm:$0xff] %v757_v57 }

// kernel: alexnet_feature_forward.4
= control target key start
LH: loop header
LB: loop body
LE: loop exit
PB: predicated region body
PF: predicated region fallthrough
CT: control target
= control target key end

     0   :  { %vm134_vm0 = vcmask 1043456   ;;  %v317_v2 = vmov 0   ;;  %vm130_vm1 = vcmask 588800   ;;  %s407_s0 = inlined_call_operand.vmem [shape: bf16[72,512], index: 0, kind: input, shape index: {}]   ;;  %s408_s2 = inlined_call_operand.vmem [shape: f32[16,1], index: 2, kind: input, shape index: {}]   ;;  %s409_s1 = inlined_call_operand.vmem [shape: bf16[16,72], index: 1, kind: input, shape index: {}]   ;;  %s410_s3 = inlined_call_operand.vmem [shape: f32[16,128], index: 3, kind: output, shape index: {}]  }
   0x1   :  { %v33_v0 = vld [vmem:[%s407_s0 + $0x80] sm:$0xff]  ;;  %v34_v1 = vld [vmem:[%s407_s0 + $0x88] sm:$0xff]  ;;  %179 = vmatprep.mubr.bf16.mxu0 %v317_v2  ;;  %222 = vmatprep.mubr.bf16.mxu1 %v317_v2 }
   0x2   :  { %v279_v3 = vcombine.high %v33_v0, %v33_v0  ;;  %v281_v4 = vcombine.high %v34_v1, %v34_v1  ;;  %v278_v5 = vcombine.low %v33_v0, %v33_v0  ;;  %v280_v6 = vcombine.low %v34_v1, %v34_v1  ;;  %v292_v7 = vld [vmem:[%s407_s0 + $0x64] ss:$16 sps:$4 sm:$0xff]   ;;  %287 = vset.pattern.permute.xlu0 %v317_v2  ;;  %v294_v8 = vld [vmem:[%s407_s0 + $0x6c] ss:$16 sps:$4 sm:$0xff]   ;;  %v296_v11 = vld [vmem:[%s407_s0 + $0x60] ss:$16 sps:$4 sm:$0xff]  }
   0x3   :  { %v297_v12 = vld [vmem:[%s407_s0 + $0x68] ss:$16 sps:$4 sm:$0xff]   ;;  %v298_v13 = vld [vmem:[%s407_s0 + $0x44] ss:$16 sps:$4 sm:$0xff]   ;;  %v300_v14 = vld [vmem:[%s407_s0 + $0x4c] ss:$16 sps:$4 sm:$0xff]  }
   0x4   :  { %282 = vmatprep.subr.msk.bf16.mxu0 %vm134_vm0, %v279_v3  ;;  %284 = vmatprep.subr.msk.bf16.mxu1 %vm134_vm0, %v281_v4  ;;  %v136_v9 = vsel %vm134_vm0, %v278_v5, 0  ;;  %v142_v10 = vsel %vm134_vm0, %v280_v6, 0  ;;  %v302_v15 = vld [vmem:[%s407_s0 + $0x40] ss:$16 sps:$4 sm:$0xff]   ;;  %v303_v16 = vld [vmem:[%s407_s0 + $0x48] ss:$16 sps:$4 sm:$0xff]  }
   0x5   :  { %154 = vmatpush1.bf16.msra.mxu0 %v136_v9  ;;  %197 = vmatpush1.bf16.msra.mxu1 %v142_v10  ;;  %v304_v17 = vld [vmem:[%s407_s0 + $0x24] ss:$16 sps:$4 sm:$0xff]   ;;  %v306_v18 = vld [vmem:[%s407_s0 + $0x2c] ss:$16 sps:$4 sm:$0xff]   ;;  %v308_v19 = vld [vmem:[%s407_s0 + $0x20] ss:$16 sps:$4 sm:$0xff]  }
   0x6   :  { %155 = vmatprep.subr.bf16.mxu0 %v292_v7  ;;  %198 = vmatprep.subr.bf16.mxu1 %v294_v8  ;;  %v309_v20 = vld [vmem:[%s407_s0 + $0x28] ss:$16 sps:$4 sm:$0xff]   ;;  %v239_v21 = vld [vmem:[%s408_s2] sm:$0xff]  ;;  %v312_v23 = vld [vmem:[%s407_s0 + $0xc] ss:$16 sps:$4 sm:$0xff]  }
   0x7   :  { %v310_v22 = vld [vmem:[%s407_s0 + $0x4] ss:$16 sps:$4 sm:$0xff]   ;;  %243 = vperm.xlu0 %287, %v239_v21   ;;  %v240_v24 = vld [vmem:[%s408_s2 + $0x8] sm:$0xff]  ;;  %v314_v25 = vld [vmem:[%s407_s0] ss:$16 sps:$4 sm:$0xff]  }
   0x8   :  { %v315_v26 = vld [vmem:[%s407_s0 + $0x8] ss:$16 sps:$4 sm:$0xff]   ;;  %v316_v27 = vld [vmem:[%s409_s1] sm:$0xff]  }
   0x9   :  { %156 = vmatpush1.bf16.msra.mxu0 %v296_v11  ;;  %199 = vmatpush1.bf16.msra.mxu1 %v297_v12 }
   0xa   :  { %157 = vmatprep.subr.bf16.mxu0 %v298_v13  ;;  %200 = vmatprep.subr.bf16.mxu1 %v300_v14 }
   0xb   :  { %248 = vperm.xlu0 %287, %v240_v24  }
   0xd   :  { %158 = vmatpush1.bf16.msra.mxu0 %v302_v15  ;;  %201 = vmatpush1.bf16.msra.mxu1 %v303_v16 }
   0xe   :  { %159 = vmatprep.subr.bf16.mxu0 %v304_v17  ;;  %202 = vmatprep.subr.bf16.mxu1 %v306_v18 }
  0x11   :  { %160 = vmatpush1.bf16.msra.mxu0 %v308_v19  ;;  %203 = vmatpush1.bf16.msra.mxu1 %v309_v20 }
  0x12   :  { %161 = vmatprep.subr.bf16.mxu0 %v310_v22  ;;  %204 = vmatprep.subr.bf16.mxu1 %v312_v23 }
  0x15   :  { %162 = vmatpush1.bf16.msra.mxu0 %v314_v25  ;;  %205 = vmatpush1.bf16.msra.mxu1 %v315_v26 }
  0x18   :  { %283 = vmatmul.mubr.msk.bf16.vlgmr.msra.gmra.mxu0 %vm130_vm1, %v316_v27  ;;  %285 = vmatmul.mubr.msk.bf16.vlgmr.msra.gmra.mxu1 %vm130_vm1, %v316_v27 }
  0x82   :  { %v244_v32 = vpop.permute.xlu0 %243 }
  0x86   :  { %v249_v45 = vpop.permute.xlu0 %248 }
  0xd8   :  { %v181_v28 = vpop.f32.mrf.mxu0  ;;  %v224_v29 = vpop.f32.mrf.mxu1 }
  0xda   :  { %v183_v30 = vpop.f32.mrf.mxu0  ;;  %v226_v31 = vpop.f32.mrf.mxu1 }
  0xdb   :  { %v233_v33 = vmax.f32 %v181_v28, %v183_v30  ;;  %v235_v34 = vmax.f32 %v224_v29, %v226_v31 }
  0xdc   :  { %v185_v35 = vpop.f32.mrf.mxu0  ;;  %v228_v36 = vpop.f32.mrf.mxu1 }
  0xdd   :  { %v237_v37 = vmax.f32 %v233_v33, %v235_v34 }
  0xde   :  { %v187_v38 = vpop.f32.mrf.mxu0  ;;  %v230_v39 = vpop.f32.mrf.mxu1 }
  0xdf   :  { %v251_v40 = vadd.f32 %v244_v32, %v237_v37  ;;  %v234_v41 = vmax.f32 %v185_v35, %v187_v38  ;;  %v236_v42 = vmax.f32 %v228_v36, %v230_v39 }
  0xe1   :  { %v253_v43 = vmax.f32 %v251_v40, 0.0  ;;  %v238_v44 = vmax.f32 %v234_v41, %v236_v42 }
  0xe3   :  { %255 = vst [vmem:[%s410_s3] sm:$0xff] %v253_v43  ;;  %v252_v46 = vadd.f32 %v249_v45, %v238_v44 }
  0xe5   :  { %v254_v47 = vmax.f32 %v252_v46, 0.0 }
  0xe7   :  { %256 = vst [vmem:[%s410_s3 + $0x8] sm:$0xff] %v254_v47 }

// kernel: alexnet_feature_forward.5
= control target key start
LH: loop header
LB: loop body
LE: loop exit
PB: predicated region body
PF: predicated region fallthrough
CT: control target
= control target key end

     0   :  { %v1857_v1 = vmov 0.0   ;;  %vm1858_vm0 = vmmov 0   ;;  %vm62_vm1 = vcmask 523264   ;;  %s2327_s0 = inlined_call_operand.vmem [shape: bf16[16,2,64], index: 0, kind: input, shape index: {}]   ;;  %s2328_s1 = inlined_call_operand.vmem [shape: bf16[64,32], index: 1, kind: input, shape index: {}]   ;;  %s2329_s2 = inlined_call_operand.vmem [shape: f32[1,32], index: 2, kind: input, shape index: {}]   ;;  %s2330_s3 = inlined_call_operand.vmem [shape: bf16[4,32,256], index: 3, kind: input, shape index: {}]   ;;  %s2331_s4 = inlined_call_operand.vmem [shape: f32[1,256], index: 4, kind: input, shape index: {}]   ;;  %s2332_s5 = inlined_call_operand.vmem [shape: bf16[256,256], index: 5, kind: input, shape index: {}]   ;;  %s2333_s6 = inlined_call_operand.vmem [shape: f32[1,256], index: 6, kind: input, shape index: {}]   ;;  %s2334_s7 = inlined_call_operand.hbm [shape: f32[2,256], index: 7, kind: output, shape index: {}]  }
   0x1   :  { %v1904_v0 = vld [vmem:[%s2328_s1 + $0x18] sm:$0xff]   ;;  %1563 = vmatprep.subr.bf16.mxu1 %v1857_v1  ;;  %1611 = vmatprep.subr.bf16.mxu0 %v1857_v1  ;;  %v1912_v2 = vld [vmem:[%s2328_s1 + $0x10] sm:$0xff]   ;;  %v1925_v3 = vld [vmem:[%s2328_s1 + $0x8] sm:$0xff]  }
   0x2   :  { %1564 = vmatpush3.bf16.msra.mxu1 %v1904_v0  ;;  %1571 = vmatprep.mubr.msk.bf16.mxu1 %vm1858_vm0, %v1857_v1  ;;  %v1932_v4 = vld [vmem:[%s2328_s1] sm:$0xff]  }
   0x3   :  { %1565 = vmatprep.subr.bf16.mxu1 %v1857_v1  ;;  %1612 = vmatpush3.bf16.msra.mxu0 %v1904_v0  ;;  %v37_v5 = vld [vmem:[%s2327_s0] sm:$0x1]  ;;  %v1394_v6 = vld [vmem:[%s2327_s0 + $0x4] sm:$0x1] }
   0x4   :  { %1613 = vmatprep.subr.bf16.mxu0 %v1857_v1  ;;  %1619 = vmatprep.mubr.msk.bf16.mxu0 %vm1858_vm0, %v1857_v1 }
   0x6   :  { %1566 = vmatpush3.bf16.msra.mxu1 %v1912_v2 }
   0x7   :  { %1567 = vmatprep.subr.bf16.mxu1 %v1857_v1  ;;  %1614 = vmatpush3.bf16.msra.mxu0 %v1912_v2 }
   0x8   :  { %1615 = vmatprep.subr.bf16.mxu0 %v1857_v1 }
   0xa   :  { %1568 = vmatpush3.bf16.msra.mxu1 %v1925_v3 }
   0xb   :  { %1569 = vmatprep.subr.bf16.mxu1 %v1857_v1  ;;  %1616 = vmatpush3.bf16.msra.mxu0 %v1925_v3 }
   0xc   :  { %1617 = vmatprep.subr.bf16.mxu0 %v1857_v1 }
   0xe   :  { %1570 = vmatpush3.bf16.msra.mxu1 %v1932_v4 }
   0xf   :  { %1575 = vmatprep.subr.bf16.mxu1 %v1857_v1  ;;  %1618 = vmatpush3.bf16.msra.mxu0 %v1932_v4 }
  0x10   :  { %1635 = vmatprep.subr.bf16.mxu0 %v1857_v1 }
  0x11   :  { %1572 = vmatmul.mubr.msk.bf16.vlgmr.msra.gmra.mxu1 %vm62_vm1, %v37_v5 }
  0x12   :  { %1576 = vmatpush3.bf16.msra.mxu1 %v1904_v0  ;;  %1583 = vmatprep.mubr.msk.bf16.mxu1 %vm1858_vm0, %v1857_v1 }
  0x13   :  { %1577 = vmatprep.subr.bf16.mxu1 %v1857_v1  ;;  %1620 = vmatmul.mubr.msk.bf16.vlgmr.msra.gmra.mxu0 %vm62_vm1, %v1394_v6 }
  0x14   :  { %1636 = vmatpush3.bf16.msra.mxu0 %v1904_v0  ;;  %1643 = vmatprep.mubr.msk.bf16.mxu0 %vm1858_vm0, %v1857_v1 }
  0x15   :  { %1637 = vmatprep.subr.bf16.mxu0 %v1857_v1 }
  0x16   :  { %1578 = vmatpush3.bf16.msra.mxu1 %v1912_v2 }
  0x17   :  { %12 = vsyncpa [#allocation3], 0  ;;  %1579 = vmatprep.subr.bf16.mxu1 %v1857_v1  ;;  %v1387_v7 = vld [vmem:[%s2327_s0 + $0x1] sm:$0x1]  ;;  %v1398_v8 = vld [vmem:[%s2327_s0 + $0x6] sm:$0x1] }
  0x18   :  { %1638 = vmatpush3.bf16.msra.mxu0 %v1912_v2  ;;  %v1389_v9 = vld [vmem:[%s2327_s0 + $0x2] sm:$0x1]  ;;  %v1391_v10 = vld [vmem:[%s2327_s0 + $0x3] sm:$0x1]  ;;  %v1396_v11 = vld [vmem:[%s2327_s0 + $0x5] sm:$0x1] }
  0x19   :  { %1639 = vmatprep.subr.bf16.mxu0 %v1857_v1  ;;  %v1400_v12 = vld [vmem:[%s2327_s0 + $0x7] sm:$0x1]  ;;  %v1765_v13 = vld [vmem:[%s2330_s3 + $0x14] ss:$8 sps:$4 sm:$0xff]   ;;  %v1763_v14 = vld [vmem:[%s2330_s3 + $0x10] ss:$8 sps:$4 sm:$0xff]  }
  0x1a   :  { %1580 = vmatpush3.bf16.msra.mxu1 %v1925_v3  ;;  %v1768_v15 = vld [vmem:[%s2330_s3 + $0x4] ss:$8 sps:$4 sm:$0xff]   ;;  %v1766_v16 = vld [vmem:[%s2330_s3] ss:$8 sps:$4 sm:$0xff]   ;;  %v1859_v17 = vmov 0   ;;  %vm468_vm2 = vcmask 261120  }
  0x1b   :  { %1581 = vmatprep.subr.bf16.mxu1 %v1857_v1  ;;  %v1771_v18 = vld [vmem:[%s2330_s3 + $0x34] ss:$8 sps:$4 sm:$0xff]   ;;  %v1769_v19 = vld [vmem:[%s2330_s3 + $0x30] ss:$8 sps:$4 sm:$0xff]   ;;  %v1774_v20 = vld [vmem:[%s2330_s3 + $0x24] ss:$8 sps:$4 sm:$0xff]  }
  0x1c   :  { %1640 = vmatpush3.bf16.msra.mxu0 %v1925_v3  ;;  %v1772_v21 = vld [vmem:[%s2330_s3 + $0x20] ss:$8 sps:$4 sm:$0xff]  }
  0x1d   :  { %1641 = vmatprep.subr.bf16.mxu0 %v1857_v1  ;;  %v2064_v44 = vld [vmem:[%s2329_s2] ss:$0 sm:$0xff]  ;;  %v1418_v57 = vld [vmem:[%s2327_s0 + $0x9] sm:$0x1] }
  0x1e   :  { %1582 = vmatpush3.bf16.msra.mxu1 %v1932_v4 }
  0x1f   :  { %1587 = vmatprep.subr.bf16.mxu1 %v1857_v1 }
  0x20   :  { %1642 = vmatpush3.bf16.msra.mxu0 %v1932_v4 }
  0x21   :  { %1584 = vmatmul.mubr.msk.bf16.vlgmr.msra.gmra.mxu1 %vm62_vm1, %v1387_v7  ;;  %484 = vmatprep.subr.bf16.mxu0 %v1771_v18  ;;  %v1437_v18 = vld [vmem:[%s2327_s0 + $0xe] sm:$0x1] }
  0x22   :  { %1588 = vmatpush3.bf16.msra.mxu1 %v1904_v0  ;;  %1595 = vmatprep.mubr.msk.bf16.mxu1 %vm1858_vm0, %v1857_v1 }
  0x23   :  { %1589 = vmatprep.subr.bf16.mxu1 %v1857_v1  ;;  %1644 = vmatmul.mubr.msk.bf16.vlgmr.msra.gmra.mxu0 %vm62_vm1, %v1398_v8  ;;  %v1422_v8 = vld [vmem:[%s2327_s0 + $0xb] sm:$0x1] }
  0x24   :  { %504 = vmatprep.mubr.bf16.mxu0 %v1859_v17  ;;  %485 = vmatpush1.bf16.msra.mxu0 %v1769_v19 }
  0x25   :  { %486 = vmatprep.subr.bf16.mxu0 %v1774_v20 }
  0x26   :  { %1590 = vmatpush3.bf16.msra.mxu1 %v1912_v2 }
  0x27   :  { %1591 = vmatprep.subr.bf16.mxu1 %v1857_v1 }
  0x28   :  { %487 = vmatpush1.bf16.msra.mxu0 %v1772_v21 }
  0x29   :  { %1659 = vmatprep.subr.bf16.mxu0 %v1857_v1 }
  0x2a   :  { %1592 = vmatpush3.bf16.msra.mxu1 %v1925_v3 }
  0x2b   :  { %1593 = vmatprep.subr.bf16.mxu1 %v1857_v1 }
  0x2e   :  { %1594 = vmatpush3.bf16.msra.mxu1 %v1932_v4 }
  0x2f   :  { %1599 = vmatprep.subr.bf16.mxu1 %v1857_v1 }
  0x31   :  { %1596 = vmatmul.mubr.msk.bf16.vlgmr.msra.gmra.mxu1 %vm62_vm1, %v1389_v9 }
  0x32   :  { %1600 = vmatpush3.bf16.msra.mxu1 %v1904_v0  ;;  %1607 = vmatprep.mubr.msk.bf16.mxu1 %vm1858_vm0, %v1857_v1 }
  0x33   :  { %1601 = vmatprep.subr.bf16.mxu1 %v1857_v1 }
  0x36   :  { %1602 = vmatpush3.bf16.msra.mxu1 %v1912_v2 }
  0x37   :  { %1603 = vmatprep.subr.bf16.mxu1 %v1857_v1 }
  0x3a   :  { %1604 = vmatpush3.bf16.msra.mxu1 %v1925_v3 }
  0x3b   :  { %1605 = vmatprep.subr.bf16.mxu1 %v1857_v1 }
  0x3e   :  { %1606 = vmatpush3.bf16.msra.mxu1 %v1932_v4 }
  0x3f   :  { %1623 = vmatprep.subr.bf16.mxu1 %v1857_v1 }
  0x41   :  { %1608 = vmatmul.mubr.msk.bf16.vlgmr.msra.gmra.mxu1 %vm62_vm1, %v1391_v10  ;;  %v1416_v10 = vld [vmem:[%s2327_s0 + $0x8] sm:$0x1] }
  0x42   :  { %1624 = vmatpush3.bf16.msra.mxu1 %v1904_v0  ;;  %1631 = vmatprep.mubr.msk.bf16.mxu1 %vm1858_vm0, %v1857_v1 }
  0x43   :  { %1625 = vmatprep.subr.bf16.mxu1 %v1857_v1 }
  0x46   :  { %1626 = vmatpush3.bf16.msra.mxu1 %v1912_v2 }
  0x47   :  { %1627 = vmatprep.subr.bf16.mxu1 %v1857_v1 }
  0x4a   :  { %1628 = vmatpush3.bf16.msra.mxu1 %v1925_v3 }
  0x4b   :  { %1629 = vmatprep.subr.bf16.mxu1 %v1857_v1 }
  0x4e   :  { %1630 = vmatpush3.bf16.msra.mxu1 %v1932_v4 }
  0x4f   :  { %1647 = vmatprep.subr.bf16.mxu1 %v1857_v1 }
  0x51   :  { %1632 = vmatmul.mubr.msk.bf16.vlgmr.msra.gmra.mxu1 %vm62_vm1, %v1396_v11  ;;  %v1420_v11 = vld [vmem:[%s2327_s0 + $0xa] sm:$0x1] }
  0x52   :  { %1648 = vmatpush3.bf16.msra.mxu1 %v1904_v0  ;;  %1655 = vmatprep.mubr.msk.bf16.mxu1 %vm1858_vm0, %v1857_v1 }
  0x53   :  { %1649 = vmatprep.subr.bf16.mxu1 %v1857_v1 }
  0x56   :  { %1650 = vmatpush3.bf16.msra.mxu1 %v1912_v2 }
  0x57   :  { %1651 = vmatprep.subr.bf16.mxu1 %v1857_v1 }
  0x5a   :  { %1652 = vmatpush3.bf16.msra.mxu1 %v1925_v3 }
  0x5b   :  { %1653 = vmatprep.subr.bf16.mxu1 %v1857_v1 }
  0x5e   :  { %1654 = vmatpush3.bf16.msra.mxu1 %v1932_v4 }
  0x5f   :  { %548 = vmatprep.subr.bf16.mxu1 %v1765_v13  ;;  %v1775_v13 = vld [vmem:[%s2330_s3 + $0x50] ss:$8 sps:$4 sm:$0xff]  }
  0x61   :  { %1656 = vmatmul.mubr.msk.bf16.vlgmr.msra.gmra.mxu1 %vm62_vm1, %v1400_v12  ;;  %v1777_v12 = vld [vmem:[%s2330_s3 + $0x54] ss:$8 sps:$4 sm:$0xff]  }
  0x62   :  { %549 = vmatpush1.bf16.msra.mxu1 %v1763_v14  ;;  %568 = vmatprep.mubr.bf16.mxu1 %v1859_v17  ;;  %v1780_v14 = vld [vmem:[%s2330_s3 + $0x44] ss:$8 sps:$4 sm:$0xff]  }
  0x63   :  { %550 = vmatprep.subr.bf16.mxu1 %v1768_v15  ;;  %v1778_v15 = vld [vmem:[%s2330_s3 + $0x40] ss:$8 sps:$4 sm:$0xff]  }
  0x66   :  { %551 = vmatpush1.bf16.msra.mxu1 %v1766_v16  ;;  %v1433_v16 = vld [vmem:[%s2327_s0 + $0xc] sm:$0x1] }
  0x67   :  { %1671 = vmatprep.subr.bf16.mxu1 %v1857_v1 }
  0xd1   :  { %v100_v22 = vpop.f32.mrf.mxu1 }
  0xd3   :  { %v1573_v23 = vpop.f32.mrf.mxu1  ;;  %v296_v24 = vpop.f32.mrf.mxu0 }
  0xd5   :  { %v103_v25 = vpop.f32.mrf.mxu1  ;;  %v1621_v26 = vpop.f32.mrf.mxu0 }
  0xd7   :  { %v1574_v27 = vpop.f32.mrf.mxu1  ;;  %v299_v28 = vpop.f32.mrf.mxu0 }
  0xd9   :  { %v1622_v29 = vpop.f32.mrf.mxu0 }
  0xe1   :  { %v145_v30 = vpop.f32.mrf.mxu1 }
  0xe2   :  { %v151_v42 = vmax.f32 %v100_v22, %v145_v30 }
  0xe3   :  { %v1585_v31 = vpop.f32.mrf.mxu1  ;;  %v387_v32 = vpop.f32.mrf.mxu0 }
  0xe5   :  { %v148_v33 = vpop.f32.mrf.mxu1  ;;  %v1645_v34 = vpop.f32.mrf.mxu0 }
  0xe7   :  { %v1586_v35 = vpop.f32.mrf.mxu1  ;;  %v390_v36 = vpop.f32.mrf.mxu0 }
  0xe9   :  { %v1646_v37 = vpop.f32.mrf.mxu0 }
  0xf1   :  { %v191_v38 = vpop.f32.mrf.mxu1 }
  0xf2   :  { %v197_v43 = vmax.f32 %v151_v42, %v191_v38 }
  0xf3   :  { %v1597_v39 = vpop.f32.mrf.mxu1 }
  0xf5   :  { %v194_v40 = vpop.f32.mrf.mxu1 }
  0xf7   :  { %v1598_v41 = vpop.f32.mrf.mxu1 }
 0x101   :  { %v237_v45 = vpop.f32.mrf.mxu1 }
 0x102   :  { %v243_v46 = vmax.f32 %v197_v43, %v237_v45 }
 0x103   :  { %v1609_v47 = vpop.f32.mrf.mxu1 }
 0x104   :  { %v250_v48 = vadd.f32 %v2064_v44, %v243_v46 }
 0x105   :  { %v240_v49 = vpop.f32.mrf.mxu1 }
 0x106   :  { %v251_v50 = vmax.f32 %v250_v48, 0.0 }
 0x107   :  { %v1610_v51 = vpop.f32.mrf.mxu1 }
 0x108   :  { %v252_v52 = vpack.c.bf16 %v251_v50, %v251_v50  ;;  %v1435_v51 = vld [vmem:[%s2327_s0 + $0xd] sm:$0x1] }
 0x10a   :  { %1415 = vmatmul.mubr.msk.bf16.vlgmr.msra.gmra.mxu1 %vm468_vm2, %v252_v52  ;;  %v1439_v52 = vld [vmem:[%s2327_s0 + $0xf] sm:$0x1] }
 0x10b   :  { %1672 = vmatpush3.bf16.msra.mxu1 %v1904_v0  ;;  %1679 = vmatprep.mubr.msk.bf16.mxu1 %vm1858_vm0, %v1857_v1 }
 0x10c   :  { %1673 = vmatprep.subr.bf16.mxu1 %v1857_v1 }
 0x10f   :  { %1674 = vmatpush3.bf16.msra.mxu1 %v1912_v2 }
 0x110   :  { %1675 = vmatprep.subr.bf16.mxu1 %v1857_v1 }
 0x111   :  { %v341_v53 = vpop.f32.mrf.mxu1 }
 0x112   :  { %v347_v58 = vmax.f32 %v296_v24, %v341_v53 }
 0x113   :  { %v1633_v54 = vpop.f32.mrf.mxu1  ;;  %1676 = vmatpush3.bf16.msra.mxu1 %v1925_v3 }
 0x114   :  { %1677 = vmatprep.subr.bf16.mxu1 %v1857_v1  ;;  %v393_v59 = vmax.f32 %v347_v58, %v387_v32  ;;  %v1786_v58 = vld [vmem:[%s2330_s3 + $0x64] ss:$8 sps:$4 sm:$0xff]  }
 0x115   :  { %v344_v55 = vpop.f32.mrf.mxu1 }
 0x117   :  { %v1634_v56 = vpop.f32.mrf.mxu1  ;;  %1678 = vmatpush3.bf16.msra.mxu1 %v1932_v4 }
 0x118   :  { %1695 = vmatprep.subr.bf16.mxu1 %v1857_v1 }
 0x11a   :  { %1680 = vmatmul.mubr.msk.bf16.vlgmr.msra.gmra.mxu1 %vm62_vm1, %v1418_v57 }
 0x11b   :  { %1696 = vmatpush3.bf16.msra.mxu1 %v1904_v0  ;;  %1703 = vmatprep.mubr.msk.bf16.mxu1 %vm1858_vm0, %v1857_v1 }
 0x11c   :  { %1697 = vmatprep.subr.bf16.mxu1 %v1857_v1 }
 0x11f   :  { %1698 = vmatpush3.bf16.msra.mxu1 %v1912_v2 }
 0x120   :  { %1699 = vmatprep.subr.bf16.mxu1 %v1857_v1 }
 0x121   :  { %v433_v60 = vpop.f32.mrf.mxu1 }
 0x122   :  { %v439_v61 = vmax.f32 %v393_v59, %v433_v60  ;;  %v1784_v59 = vld [vmem:[%s2330_s3 + $0x60] ss:$8 sps:$4 sm:$0xff]   ;;  %v1787_v60 = vld [vmem:[%s2332_s5 + $0x70] ss:$8 sps:$4 sm:$0xff]  }
 0x123   :  { %v1657_v62 = vpop.f32.mrf.mxu1  ;;  %1700 = vmatpush3.bf16.msra.mxu1 %v1925_v3 }
 0x124   :  { %v440_v63 = vadd.f32 %v2064_v44, %v439_v61  ;;  %1701 = vmatprep.subr.bf16.mxu1 %v1857_v1  ;;  %v1789_v61 = vld [vmem:[%s2332_s5 + $0x74] ss:$8 sps:$4 sm:$0xff]   ;;  %v1792_v62 = vld [vmem:[%s2332_s5 + $0x64] ss:$8 sps:$4 sm:$0xff]  }
 0x125   :  { %v436_v5 = vpop.f32.mrf.mxu1 }
 0x126   :  { %v441_v6 = vmax.f32 %v440_v63, 0.0  ;;  %v1790_v63 = vld [vmem:[%s2332_s5 + $0x60] ss:$8 sps:$4 sm:$0xff]   ;;  %v1795_v5 = vld [vmem:[%s2332_s5 + $0x54] ss:$8 sps:$4 sm:$0xff]  }
 0x127   :  { %v1658_v7 = vpop.f32.mrf.mxu1  ;;  %1702 = vmatpush3.bf16.msra.mxu1 %v1932_v4 }
 0x128   :  { %v442_v9 = vpack.c.bf16 %v441_v6, %v441_v6  ;;  %1707 = vmatprep.subr.bf16.mxu1 %v1857_v1  ;;  %v1793_v6 = vld [vmem:[%s2332_s5 + $0x50] ss:$8 sps:$4 sm:$0xff]   ;;  %v1798_v7 = vld [vmem:[%s2332_s5 + $0x44] ss:$8 sps:$4 sm:$0xff]  }
 0x12a   :  { %1410 = vmatmul.mubr.msk.bf16.vlgmr.msra.gmra.mxu0 %vm468_vm2, %v442_v9  ;;  %1704 = vmatmul.mubr.msk.bf16.vlgmr.msra.gmra.mxu1 %vm62_vm1, %v1422_v8  ;;  %v1796_v8 = vld [vmem:[%s2332_s5 + $0x40] ss:$8 sps:$4 sm:$0xff]   ;;  %v1801_v9 = vld [vmem:[%s2332_s5 + $0x34] ss:$8 sps:$4 sm:$0xff]  }
 0x12b   :  { %1660 = vmatpush3.bf16.msra.mxu0 %v1904_v0  ;;  %1667 = vmatprep.mubr.msk.bf16.mxu0 %vm1858_vm0, %v1857_v1 }
 0x12c   :  { %1661 = vmatprep.subr.bf16.mxu0 %v1857_v1  ;;  %1708 = vmatpush3.bf16.msra.mxu1 %v1904_v0 }
 0x12d   :  { %1709 = vmatprep.subr.bf16.mxu1 %v1857_v1  ;;  %1715 = vmatprep.mubr.msk.bf16.mxu1 %vm1858_vm0, %v1857_v1 }
 0x12f   :  { %1662 = vmatpush3.bf16.msra.mxu0 %v1912_v2 }
 0x130   :  { %1663 = vmatprep.subr.bf16.mxu0 %v1857_v1  ;;  %1710 = vmatpush3.bf16.msra.mxu1 %v1912_v2 }
 0x131   :  { %1711 = vmatprep.subr.bf16.mxu1 %v1857_v1 }
 0x133   :  { %1664 = vmatpush3.bf16.msra.mxu0 %v1925_v3 }
 0x134   :  { %1665 = vmatprep.subr.bf16.mxu0 %v1857_v1  ;;  %1712 = vmatpush3.bf16.msra.mxu1 %v1925_v3 }
 0x135   :  { %1713 = vmatprep.subr.bf16.mxu1 %v1857_v1 }
 0x137   :  { %1666 = vmatpush3.bf16.msra.mxu0 %v1932_v4 }
 0x138   :  { %1683 = vmatprep.subr.bf16.mxu0 %v1857_v1  ;;  %1714 = vmatpush3.bf16.msra.mxu1 %v1932_v4 }
 0x139   :  { %1731 = vmatprep.subr.bf16.mxu1 %v1857_v1 }
 0x13a   :  { %1668 = vmatmul.mubr.msk.bf16.vlgmr.msra.gmra.mxu0 %vm62_vm1, %v1416_v10  ;;  %v1799_v10 = vld [vmem:[%s2332_s5 + $0x30] ss:$8 sps:$4 sm:$0xff]  }
 0x13b   :  { %1684 = vmatpush3.bf16.msra.mxu0 %v1904_v0  ;;  %1691 = vmatprep.mubr.msk.bf16.mxu0 %vm1858_vm0, %v1857_v1 }
 0x13c   :  { %1685 = vmatprep.subr.bf16.mxu0 %v1857_v1  ;;  %1716 = vmatmul.mubr.msk.bf16.vlgmr.msra.gmra.mxu1 %vm62_vm1, %v1433_v16  ;;  %v1808_v16 = vld [vmem:[%s2332_s5] ss:$8 sps:$4 sm:$0xff]  }
 0x13d   :  { %1732 = vmatpush3.bf16.msra.mxu1 %v1904_v0  ;;  %1739 = vmatprep.mubr.msk.bf16.mxu1 %vm1858_vm0, %v1857_v1 }
 0x13e   :  { %1733 = vmatprep.subr.bf16.mxu1 %v1857_v1 }
 0x13f   :  { %1686 = vmatpush3.bf16.msra.mxu0 %v1912_v2 }
 0x140   :  { %1687 = vmatprep.subr.bf16.mxu0 %v1857_v1 }
 0x141   :  { %1734 = vmatpush3.bf16.msra.mxu1 %v1912_v2 }
 0x142   :  { %1735 = vmatprep.subr.bf16.mxu1 %v1857_v1 }
 0x143   :  { %1688 = vmatpush3.bf16.msra.mxu0 %v1925_v3 }
 0x144   :  { %1689 = vmatprep.subr.bf16.mxu0 %v1857_v1 }
 0x145   :  { %1736 = vmatpush3.bf16.msra.mxu1 %v1925_v3 }
 0x146   :  { %1737 = vmatprep.subr.bf16.mxu1 %v1857_v1 }
 0x147   :  { %1690 = vmatpush3.bf16.msra.mxu0 %v1932_v4 }
 0x148   :  { %803 = vmatprep.subr.bf16.mxu0 %v1777_v12  ;;  %v1802_v12 = vld [vmem:[%s2332_s5 + $0x20] ss:$8 sps:$4 sm:$0xff]  }
 0x149   :  { %1738 = vmatpush3.bf16.msra.mxu1 %v1932_v4 }
 0x14a   :  { %1692 = vmatmul.mubr.msk.bf16.vlgmr.msra.gmra.mxu0 %vm62_vm1, %v1420_v11  ;;  %v1804_v11 = vld [vmem:[%s2332_s5 + $0x24] ss:$8 sps:$4 sm:$0xff]  }
 0x14b   :  { %823 = vmatprep.mubr.bf16.mxu0 %v1859_v17  ;;  %804 = vmatpush1.bf16.msra.mxu0 %v1775_v13  ;;  %v1807_v13 = vld [vmem:[%s2332_s5 + $0x14] ss:$8 sps:$4 sm:$0xff]  }
 0x14c   :  { %805 = vmatprep.subr.bf16.mxu0 %v1780_v14  ;;  %1740 = vmatmul.mubr.msk.bf16.vlgmr.msra.gmra.mxu1 %vm62_vm1, %v1437_v18  ;;  %v1805_v14 = vld [vmem:[%s2332_s5 + $0x10] ss:$8 sps:$4 sm:$0xff]   ;;  %v1813_v18 = vld [vmem:[%s2332_s5 + $0xf4] ss:$8 sps:$4 sm:$0xff]  }
 0x14d   :  { %1080 = vmatprep.mubr.bf16.mxu1 %v1859_v17 }
 0x14f   :  { %806 = vmatpush1.bf16.msra.mxu0 %v1778_v15  ;;  %v1810_v15 = vld [vmem:[%s2332_s5 + $0x4] ss:$8 sps:$4 sm:$0xff]  }
 0x150   :  { %1719 = vmatprep.subr.bf16.mxu0 %v1857_v1 }
 0x1ca   :  { %v570_v19 = vpop.f32.mrf.mxu1 }
 0x1cc   :  { %v572_v20 = vpop.f32.mrf.mxu1 }
 0x1ce   :  { %v574_v21 = vpop.f32.mrf.mxu1 }
 0x1cf   :  { %v1814_v21 = vld [vmem:[%s2332_s5 + $0xe0] ss:$8 sps:$4 sm:$0xff]  }
 0x1d0   :  { %v575_v22 = vpop.f32.mrf.mxu1 }
 0x1d1   :  { %v1819_v22 = vld [vmem:[%s2332_s5 + $0xd4] ss:$8 sps:$4 sm:$0xff]  }
 0x1da   :  { %v661_v23 = vpop.f32.mrf.mxu1 }
 0x1dc   :  { %v1681_v24 = vpop.f32.mrf.mxu1 }
 0x1dd   :  { %v1822_v24 = vld [vmem:[%s2332_s5 + $0xc4] ss:$8 sps:$4 sm:$0xff]  }
 0x1de   :  { %v664_v25 = vpop.f32.mrf.mxu1 }
 0x1df   :  { %v1820_v25 = vld [vmem:[%s2332_s5 + $0xc0] ss:$8 sps:$4 sm:$0xff]  }
 0x1e0   :  { %v1682_v26 = vpop.f32.mrf.mxu1 }
 0x1e1   :  { %v1825_v26 = vld [vmem:[%s2332_s5 + $0xb4] ss:$8 sps:$4 sm:$0xff]  }
 0x1ea   :  { %v506_v27 = vpop.f32.mrf.mxu0  ;;  %v753_v28 = vpop.f32.mrf.mxu1 }
 0x1eb   :  { %v2167_v29 = vadd.f32 %v570_v19, %v506_v27  ;;  %v1811_v19 = vld [vmem:[%s2332_s5 + $0xf0] ss:$8 sps:$4 sm:$0xff]  }
 0x1ec   :  { %v508_v30 = vpop.f32.mrf.mxu0  ;;  %v1705_v31 = vpop.f32.mrf.mxu1  ;;  %v1823_v27 = vld [vmem:[%s2332_s5 + $0xb0] ss:$8 sps:$4 sm:$0xff]  }
 0x1ed   :  { %v2169_v32 = vadd.f32 %v572_v20, %v508_v30  ;;  %v1816_v20 = vld [vmem:[%s2332_s5 + $0xe4] ss:$8 sps:$4 sm:$0xff]  }
 0x1ee   :  { %v510_v33 = vpop.f32.mrf.mxu0  ;;  %v756_v34 = vpop.f32.mrf.mxu1 }
 0x1f0   :  { %v511_v35 = vpop.f32.mrf.mxu0  ;;  %v1706_v17 = vpop.f32.mrf.mxu1 }
 0x1fa   :  { %v616_v36 = vpop.f32.mrf.mxu0 }
 0x1fb   :  { %v667_v40 = vmax.f32 %v616_v36, %v661_v23  ;;  %v1817_v23 = vld [vmem:[%s2332_s5 + $0xd0] ss:$8 sps:$4 sm:$0xff]  }
 0x1fc   :  { %v1669_v37 = vpop.f32.mrf.mxu0 }
 0x1fe   :  { %v619_v38 = vpop.f32.mrf.mxu0 }
 0x200   :  { %v1670_v39 = vpop.f32.mrf.mxu0 }
 0x20a   :  { %v707_v41 = vpop.f32.mrf.mxu0 }
 0x20b   :  { %v713_v42 = vmax.f32 %v667_v40, %v707_v41 }
 0x20c   :  { %v1693_v43 = vpop.f32.mrf.mxu0 }
 0x20d   :  { %v759_v45 = vmax.f32 %v713_v42, %v753_v28 }
 0x20e   :  { %v710_v46 = vpop.f32.mrf.mxu0 }
 0x20f   :  { %v760_v47 = vadd.f32 %v2064_v44, %v759_v45 }
 0x210   :  { %v1694_v48 = vpop.f32.mrf.mxu0 }
 0x211   :  { %v761_v49 = vmax.f32 %v760_v47, 0.0 }
 0x213   :  { %v762_v50 = vpack.c.bf16 %v761_v49, %v761_v49  ;;  %v1826_v49 = vld [vmem:[%s2332_s5 + $0xa0] ss:$8 sps:$4 sm:$0xff]  }
 0x215   :  { %1432 = vmatmul.mubr.msk.bf16.vlgmr.msra.gmra.mxu0 %vm468_vm2, %v762_v50  ;;  %v1829_v50 = vld [vmem:[%s2332_s5 + $0x90] ss:$8 sps:$4 sm:$0xff]  }
 0x216   :  { %1720 = vmatpush3.bf16.msra.mxu0 %v1904_v0  ;;  %1727 = vmatprep.mubr.msk.bf16.mxu0 %vm1858_vm0, %v1857_v1 }
 0x217   :  { %1721 = vmatprep.subr.bf16.mxu0 %v1857_v1 }
 0x21a   :  { %1722 = vmatpush3.bf16.msra.mxu0 %v1912_v2 }
 0x21b   :  { %1723 = vmatprep.subr.bf16.mxu0 %v1857_v1 }
 0x21e   :  { %1724 = vmatpush3.bf16.msra.mxu0 %v1925_v3 }
 0x21f   :  { %1725 = vmatprep.subr.bf16.mxu0 %v1857_v1 }
 0x222   :  { %1726 = vmatpush3.bf16.msra.mxu0 %v1932_v4 }
 0x223   :  { %1743 = vmatprep.subr.bf16.mxu0 %v1857_v1 }
 0x225   :  { %1728 = vmatmul.mubr.msk.bf16.vlgmr.msra.gmra.mxu0 %vm62_vm1, %v1435_v51  ;;  %v1834_v51 = vld [vmem:[%s2332_s5 + $0x84] ss:$8 sps:$4 sm:$0xff]  }
 0x226   :  { %1744 = vmatpush3.bf16.msra.mxu0 %v1904_v0  ;;  %1751 = vmatprep.mubr.msk.bf16.mxu0 %vm1858_vm0, %v1857_v1  ;;  %v2200_v0 = vpop.f32.mrf.mxu1 }
 0x227   :  { %1745 = vmatprep.subr.bf16.mxu0 %v1857_v1 }
 0x228   :  { %v1717_v53 = vpop.f32.mrf.mxu1 }
 0x22a   :  { %1746 = vmatpush3.bf16.msra.mxu0 %v1912_v2  ;;  %v876_v54 = vpop.f32.mrf.mxu1 }
 0x22b   :  { %1747 = vmatprep.subr.bf16.mxu0 %v1857_v1 }
 0x22c   :  { %v1718_v55 = vpop.f32.mrf.mxu1 }
 0x22d   :  { %v1091_v55 = vld [vmem:[%s2331_s4] sm:$0x3]  ;;  %s1860_s4 = smov [#allocation2]  }
 0x22e   :  { %1748 = vmatpush3.bf16.msra.mxu0 %v1925_v3  ;;  %v2202_v2 = vpop.f32.mrf.mxu1  ;;  %s1374_s1 = sshll.u32 %s1860_s4, 4  ;;  %s1375_s1 = int_to_ptr.vmem [resolvable:$true] %s1374_s1 }
 0x22f   :  { %1749 = vmatprep.subr.bf16.mxu0 %v1857_v1  ;;  %v1783_v1 = vld [vmem:[%s2330_s3 + $0x74] ss:$8 sps:$4 sm:$0xff]   ;;  %s1835_s12 = scalar_lea.vmem %s1375_s1, 64  ;;  %p1840_p1 = scmp.lt.s32.totalorder %s1375_s1, %s1375_s1 }
 0x230   :  { %v1741_v56 = vpop.f32.mrf.mxu1  ;;  %1060 = vmatprep.subr.bf16.mxu1 %v1783_v1  ;;  %p1836_p0 = scmp.ne.s32.totalorder %s1375_s1, %s1835_s12  ;;  %p1841_p2 = scmp.lt.s32.totalorder %s1835_s12, %s1835_s12 }
 0x232   :  { %1750 = vmatpush3.bf16.msra.mxu0 %v1932_v4  ;;  %v967_v57 = vpop.f32.mrf.mxu1  ;;  %v1781_v4 = vld [vmem:[%s2330_s3 + $0x70] ss:$8 sps:$4 sm:$0xff]   ;;  %p1842_p3 = por %p1841_p2, %p1840_p1 }
 0x233   :  { %1061 = vmatpush1.bf16.msra.mxu1 %v1781_v4  ;;  %1313 = vmatprep.subr.bf16.mxu0 %v1789_v61 }
 0x234   :  { %v1742_v3 = vpop.f32.mrf.mxu1  ;;  %1062 = vmatprep.subr.bf16.mxu1 %v1786_v58  ;;  %p1843_p4 = pnand %p1842_p3, %p1836_p0 }
 0x235   :  { %1752 = vmatmul.mubr.msk.bf16.vlgmr.msra.gmra.mxu0 %vm62_vm1, %v1439_v52  ;;  %v1832_v52 = vld [vmem:[%s2332_s5 + $0x80] ss:$8 sps:$4 sm:$0xff]  }
 0x236   :  { %1314 = vmatpush1.bf16.msra.mxu0 %v1787_v60 }
 0x237   :  { %1063 = vmatpush1.bf16.msra.mxu1 %v1784_v59  ;;  %1315 = vmatprep.subr.bf16.mxu0 %v1792_v62 }
 0x23a   :  { %1316 = vmatpush1.bf16.msra.mxu0 %v1790_v63 }
 0x23b   :  { %1317 = vmatprep.subr.bf16.mxu0 %v1795_v5 }
 0x23e   :  { %1318 = vmatpush1.bf16.msra.mxu0 %v1793_v6 }
 0x23f   :  { %1319 = vmatprep.subr.bf16.mxu0 %v1798_v7 }
 0x242   :  { %1320 = vmatpush1.bf16.msra.mxu0 %v1796_v8  ;;  %v1141_v8 = vld [vmem:[%s2333_s6] sm:$0x3] }
 0x243   :  { %1321 = vmatprep.subr.bf16.mxu0 %v1801_v9 }
 0x246   :  { %1322 = vmatpush1.bf16.msra.mxu0 %v1799_v10 }
 0x247   :  { %1323 = vmatprep.subr.bf16.mxu0 %v1804_v11 }
 0x24a   :  { %1324 = vmatpush1.bf16.msra.mxu0 %v1802_v12 }
 0x24b   :  { %1325 = vmatprep.subr.bf16.mxu0 %v1807_v13 }
 0x24e   :  { %1326 = vmatpush1.bf16.msra.mxu0 %v1805_v14 }
 0x24f   :  { %1327 = vmatprep.subr.bf16.mxu0 %v1810_v15 }
 0x252   :  { %1328 = vmatpush1.bf16.msra.mxu0 %v1808_v16 }
 0x253   :  { %1329 = vmatprep.subr.bf16.mxu0 %v1813_v18 }
 0x256   :  { %1330 = vmatpush2.bf16.msra.mxu0 %v1811_v19 }
 0x257   :  { %1331 = vmatprep.subr.bf16.mxu0 %v1816_v20 }
 0x25a   :  { %1332 = vmatpush2.bf16.msra.mxu0 %v1814_v21 }
 0x25b   :  { %1333 = vmatprep.subr.bf16.mxu0 %v1819_v22 }
 0x25e   :  { %1334 = vmatpush2.bf16.msra.mxu0 %v1817_v23 }
 0x25f   :  { %1335 = vmatprep.subr.bf16.mxu0 %v1822_v24 }
 0x262   :  { %1336 = vmatpush2.bf16.msra.mxu0 %v1820_v25 }
 0x263   :  { %1337 = vmatprep.subr.bf16.mxu0 %v1825_v26 }
 0x266   :  { %1338 = vmatpush2.bf16.msra.mxu0 %v1823_v27 }
 0x2d5   :  { %v825_v28 = vpop.f32.mrf.mxu0 }
 0x2d6   :  { %v832_v30 = vadd.f32 %v825_v28, %v2167_v29 }
 0x2d7   :  { %v827_v31 = vpop.f32.mrf.mxu0 }
 0x2d8   :  { %v833_v33 = vadd.f32 %v827_v31, %v2169_v32  ;;  %v1828_v32 = vld [vmem:[%s2332_s5 + $0xa4] ss:$8 sps:$4 sm:$0xff]  }
 0x2d9   :  { %v829_v34 = vpop.f32.mrf.mxu0  ;;  %1339 = vmatprep.subr.bf16.mxu0 %v1828_v32 }
 0x2da   :  { %1340 = vmatpush2.bf16.msra.mxu0 %v1826_v49 }
 0x2db   :  { %v830_v35 = vpop.f32.mrf.mxu0 }
 0x2e5   :  { %v918_v17 = vpop.f32.mrf.mxu0 }
 0x2e6   :  { %v924_v39 = vmax.f32 %v2200_v0, %v918_v17  ;;  %v1093_v0 = vlaneseq }
 0x2e7   :  { %v1729_v36 = vpop.f32.mrf.mxu0 }
 0x2e8   :  { %v970_v40 = vmax.f32 %v924_v39, %v2202_v2  ;;  %v1094_v53 = vshrl.u32 %v1093_v0, 7 }
 0x2e9   :  { %v921_v37 = vpop.f32.mrf.mxu0 }
 0x2ea   :  { %v1095_v54 = vsub.s32 0, %v1094_v53  ;;  %v1099_v2 = vsub.s32 1, %v1094_v53 }
 0x2eb   :  { %v1730_v38 = vpop.f32.mrf.mxu0 }
 0x2ec   :  { %v1096_v56 = vrot.slane %v1091_v55, %v1095_v54  ;;  %v1100_v1 = vrot.slane %v1091_v55, %v1099_v2  ;;  %v1146_v9 = vrot.slane %v1141_v8, %v1095_v54  ;;  %v1150_v10 = vrot.slane %v1141_v8, %v1099_v2 }
 0x2f5   :  { %v1010_v41 = vpop.f32.mrf.mxu0 }
 0x2f6   :  { %v1016_v42 = vmax.f32 %v970_v40, %v1010_v41 }
 0x2f7   :  { %v1753_v43 = vpop.f32.mrf.mxu0 }
 0x2f8   :  { %v1017_v45 = vadd.f32 %v2064_v44, %v1016_v42  ;;  %v1831_v44 = vld [vmem:[%s2332_s5 + $0x94] ss:$8 sps:$4 sm:$0xff]  }
 0x2f9   :  { %v1013_v46 = vpop.f32.mrf.mxu0  ;;  %1341 = vmatprep.subr.bf16.mxu0 %v1831_v44 }
 0x2fa   :  { %v1018_v29 = vmax.f32 %v1017_v45, 0.0  ;;  %1342 = vmatpush2.bf16.msra.mxu0 %v1829_v50 }
 0x2fb   :  { %v1754_v47 = vpop.f32.mrf.mxu0  ;;  %1343 = vmatprep.subr.bf16.mxu0 %v1834_v51 }
 0x2fc   :  { %v1019_v48 = vpack.c.bf16 %v1018_v29, %v1018_v29 }
 0x2fe   :  { %1449 = vmatmul.mubr.msk.bf16.vlgmr.msra.gmra.mxu1 %vm468_vm2, %v1019_v48  ;;  %1344 = vmatpush2.bf16.msra.mxu0 %v1832_v52 }
 0x3be   :  { %v1082_v57 = vpop.f32.mrf.mxu1 }
 0x3bf   :  { %v1089_v3 = vadd.f32 %v1082_v57, %v832_v30 }
 0x3c0   :  { %v1084_v4 = vpop.f32.mrf.mxu1 }
 0x3c1   :  { %v1103_v58 = vadd.f32 %v1096_v56, %v1089_v3  ;;  %v1090_v59 = vadd.f32 %v1084_v4, %v833_v33 }
 0x3c2   :  { %v1086_v60 = vpop.f32.mrf.mxu1 }
 0x3c3   :  { %v1104_v61 = vadd.f32 %v1100_v1, %v1090_v59  ;;  %v1105_v62 = vmax.f32 %v1103_v58, 0.0 }
 0x3c4   :  { %v1087_v63 = vpop.f32.mrf.mxu1 }
 0x3c5   :  { %v1106_v5 = vmax.f32 %v1104_v61, 0.0  ;;  %v1107_v7 = vpack.c.bf16 %v1105_v62, %v1105_v62 }
 0x3c7   :  { %v1108_v6 = vpack.c.bf16 %v1106_v5, %v1106_v5 }
 0x3c9   :  { %1345 = vmatprep.mubr.bf16.mxu0 %v1108_v6 }
 0x3ca   :  { %1346 = vmatmul.mubr.bf16.vlgmr.msra.gmra.mxu0 %v1107_v7 }
 0x48a   :  { %v1347_v11 = vpop.f32.mrf.mxu0 }
 0x48b   :  { %v1348_v12 = vadd.f32 %v1347_v11, %v1146_v9 }
 0x48c   :  { %v1349_v13 = vpop.f32.mrf.mxu0 }
 0x48d   :  { %v1350_v14 = vadd.f32 %v1349_v13, %v1150_v10  ;;  %v1354_v16 = vmax.f32 %v1348_v12, 0.0 }
 0x48e   :  { %v1351_v15 = vpop.f32.mrf.mxu0 }
 0x48f   :  { %v1355_v18 = vmax.f32 %v1350_v14, 0.0 }
 0x490   :  { %v1352_v19 = vpop.f32.mrf.mxu0 }
 0x491   :  { %v1358_v20 = vcombine.low %v1354_v16, %v1355_v18 }
 0x493   :  { %1482 = vst.sshfl [vmem:[#allocation2] sm:$0x33 pattern:$0x76325410] %v1358_v20 }
 0x494   :  { %1846 = shalt.err (!%p1843_p4)
}
 0x495   :  { %1377 = dma.vmem_to_hbm [thread:$0]  %s1375_s1, 64, %s2334_s7, [#allocation3]  }
 0x496   :  { %1855 = dma.done.wait [#allocation3], 64  }
 0x497   :  { %1856 = vsyncadd [#allocation3], 4294967232 }
 0x498   :  { %1381 = vsyncpa [#allocation3], 1 }

</bundles_post_ra>
